<compile_context>
chip_gen: v7x
topology: tpu7x:2x2x1
jax: 0.10.0
libtpu: 0.0.40
codegen_flags: <defaults>
</compile_context>

<pallas_src>
import jax
import jax.numpy as jnp
from jax.experimental import pallas as pl
from jax.experimental.pallas import tpu as pltpu


def _make_kernel(B, S, H, D_in, D_out):
    G = 4 * H

    def act(g, c):
        # One full-width sigmoid on the (B, 4H) gate tile; tanh(z) of the g-gate
        # recovered as 2*sigmoid(2z)-1 because its W/b columns were pre-scaled
        # by 2 at prep time (saves one EUP pass per cell per step).
        sg = jax.nn.sigmoid(g)
        i = sg[:, 0 * H:1 * H]
        f = sg[:, 1 * H:2 * H]
        gg = 2.0 * sg[:, 2 * H:3 * H] - 1.0
        o = sg[:, 3 * H:4 * H]
        c_new = f * c + i * gg
        h_new = o * jnp.tanh(c_new)
        return h_new, c_new

    def kernel(x_ref, wih1_ref, b1_ref, whh1_ref, wih2_ref, whh2_ref,
               b2_ref, wblk_ref, bblk_ref, o_ref, g1x_ref, h2slab_ref):
        # Hoisted layer-1 input projection: one MXU push for the whole sequence,
        # bias folded in, result parked in VMEM scratch (off the serial chain).
        x2 = x_ref[...].reshape(B * S, D_in)                     # (B*S, D_in)
        g1x_ref[...] = (jnp.dot(x2, wih1_ref[...],
                                preferred_element_type=jnp.float32)
                        + b1_ref[...]).reshape(B, S, G)

        # Broadcast hoisted out of the loop (JAX does not CSE broadcast_in_dim).
        b2b = jnp.broadcast_to(b2_ref[...], (B, G))

        zeros = jnp.zeros((B, H), jnp.float32)
        h1, c1, h2, c2 = zeros, zeros, zeros, zeros

        # Statically unrolled serial recurrence.  Weight tiles are re-loaded at
        # their use sites (VMEM vld is cheap) to keep vreg live ranges bounded.
        for t in range(S):
            g1 = g1x_ref[:, t, :] + jnp.dot(
                h1, whh1_ref[...], preferred_element_type=jnp.float32)
            h1, c1 = act(g1, c1)

            g2 = (jnp.dot(h1, wih2_ref[...],
                          preferred_element_type=jnp.float32)
                  + jnp.dot(h2, whh2_ref[...],
                            preferred_element_type=jnp.float32)
                  + b2b)
            h2, c2 = act(g2, c2)

            # Park h2 in the output slab (bounds live ranges, feeds the head).
            h2slab_ref[:, t * H:(t + 1) * H] = h2

        # Hoisted Linear head: one matmul against the block-diagonal weight
        # produces the output directly in its final (B, S*D_out) layout.
        o_ref[...] = (jnp.dot(h2slab_ref[...], wblk_ref[...],
                              preferred_element_type=jnp.float32)
                      + bblk_ref[...])

    return kernel


def prepare_params(params, n_hidden, seq_len):
    """One-time static prep, hoisted out of the per-call hot path.

    - W_ih / W_hh kept separate, the two biases per cell pre-summed.
    - g-gate columns (cols [2H:3H]) of W/b pre-scaled by 2 so the kernel can use
      tanh(z) = 2*sigmoid(2z) - 1 with a single full-width sigmoid.
    - Linear head expanded to a block-diagonal (S*H, S*7) weight + lane-tiled
      bias so the kernel emits the output directly as (B, S*7).
    """
    H = n_hidden
    S = seq_len
    D_out = params["wlin"].shape[1]

    def scale_g(w):
        return w.at[:, 2 * H:3 * H].multiply(2.0)

    wih1 = scale_g(params["wih1"])
    whh1 = scale_g(params["whh1"])
    b1 = scale_g(params["bih1"] + params["bhh1"])
    wih2 = scale_g(params["wih2"])
    whh2 = scale_g(params["whh2"])
    b2 = scale_g(params["bih2"] + params["bhh2"])

    wblk = jnp.zeros((S * H, S * D_out), jnp.float32)
    for t in range(S):
        wblk = wblk.at[t * H:(t + 1) * H,
                       t * D_out:(t + 1) * D_out].set(params["wlin"])
    bblk = jnp.tile(params["blin"], (1, S))                      # (1, S*D_out)

    return {"wih1": wih1, "b1": b1, "whh1": whh1,
            "wih2": wih2, "whh2": whh2, "b2": b2,
            "wblk": wblk, "bblk": bblk, "d_out": D_out, "seq_len": S}


def lstm_predictor_forward(x, prep, n_hidden):
    """x: (batch, seq, 19) float32 -> (batch, seq*7) float32."""
    B, S, D_in = x.shape
    H = n_hidden
    D_out = prep["d_out"]
    assert S == prep["seq_len"]

    vmem = pl.BlockSpec(memory_space=pltpu.MemorySpace.VMEM)

    return pl.pallas_call(
        _make_kernel(B, S, H, D_in, D_out),
        out_shape=jax.ShapeDtypeStruct((B, S * D_out), jnp.float32),
        in_specs=[vmem] * 9,
        out_specs=vmem,
        scratch_shapes=[
            pltpu.VMEM((B, S, 4 * H), jnp.float32),   # hoisted input projection
            pltpu.VMEM((B, S * H), jnp.float32),      # h2 slab for the head
        ],
    )(x, prep["wih1"], prep["b1"], prep["whh1"],
      prep["wih2"], prep["whh2"], prep["b2"], prep["wblk"], prep["bblk"])


def reference_forward(x, params, n_hidden):
    """Pure-JAX reference mirroring the PyTorch forward (future=0)."""
    B, S, _ = x.shape
    H = n_hidden
    h1 = jnp.zeros((B, H), jnp.float32)
    c1 = jnp.zeros((B, H), jnp.float32)
    h2 = jnp.zeros((B, H), jnp.float32)
    c2 = jnp.zeros((B, H), jnp.float32)

    def cell(xt, h, c, wih, bih, whh, bhh):
        g = xt @ wih + bih + h @ whh + bhh
        i = jax.nn.sigmoid(g[:, 0 * H:1 * H])
        f = jax.nn.sigmoid(g[:, 1 * H:2 * H])
        gg = jnp.tanh(g[:, 2 * H:3 * H])
        o = jax.nn.sigmoid(g[:, 3 * H:4 * H])
        c_new = f * c + i * gg
        return o * jnp.tanh(c_new), c_new

    outs = []
    for t in range(S):
        xt = x[:, t, :]
        h1, c1 = cell(xt, h1, c1, params["wih1"], params["bih1"],
                      params["whh1"], params["bhh1"])
        h2, c2 = cell(h1, h2, c2, params["wih2"], params["bih2"],
                      params["whh2"], params["bhh2"])
        outs.append(h2 @ params["wlin"] + params["blin"])
    return jnp.concatenate(outs, axis=1)


def init_params(key, n_hidden):
    """Deterministic init, PyTorch-style U(-1/sqrt(H), 1/sqrt(H))."""
    H = n_hidden
    D_in, D_out = 19, 7
    bound = 1.0 / (H ** 0.5)
    keys = jax.random.split(key, 11)
    u = lambda k, shape: jax.random.uniform(
        k, shape, jnp.float32, minval=-bound, maxval=bound)
    return {
        # stored pre-transposed: (in, 4H) so the kernel does x @ W,
        # gate column order i, f, g, o (PyTorch LSTMCell convention).
        "wih1": u(keys[0], (D_in, 4 * H)),
        "bih1": u(keys[1], (1, 4 * H)),
        "whh1": u(keys[2], (H, 4 * H)),
        "bhh1": u(keys[3], (1, 4 * H)),
        "wih2": u(keys[4], (H, 4 * H)),
        "bih2": u(keys[5], (1, 4 * H)),
        "whh2": u(keys[6], (H, 4 * H)),
        "bhh2": u(keys[7], (1, 4 * H)),
        "wlin": u(keys[8], (H, D_out)),
        "blin": u(keys[9], (1, D_out)),
    }


if __name__ == "__main__":
    B, S, D_in = 2, 8, 19
    n_hidden = 32

    key = jax.random.PRNGKey(0)
    k_params, k_x = jax.random.split(key)
    params = init_params(k_params, n_hidden)
    x = jax.random.normal(k_x, (B, S, D_in), jnp.float32)

    # One-time static prep (not part of the per-call hot path).
    prep = prepare_params(params, n_hidden, S)

    out = lstm_predictor_forward(x, prep, n_hidden)
    out = jax.block_until_ready(out)

    ref = reference_forward(x, params, n_hidden)
    assert out.shape == (B, S * 7), out.shape
    # Slightly looser than 1e-5: tanh is computed as 2*sigmoid(2z)-1 in-kernel.
    assert jnp.allclose(out, ref, rtol=1e-4, atol=1e-4), "mismatch vs reference"

    print("KERNEL_OK")
</pallas_src>

<mosaic_0001>
module attributes {stable_mosaic.version = 11 : i64} {
  func.func @kernel(%arg0: memref<2x8x19xf32, #tpu.memory_space<vmem>>, %arg1: memref<19x128xf32, #tpu.memory_space<vmem>>, %arg2: memref<1x128xf32, #tpu.memory_space<vmem>>, %arg3: memref<32x128xf32, #tpu.memory_space<vmem>>, %arg4: memref<32x128xf32, #tpu.memory_space<vmem>>, %arg5: memref<32x128xf32, #tpu.memory_space<vmem>>, %arg6: memref<1x128xf32, #tpu.memory_space<vmem>>, %arg7: memref<256x56xf32, #tpu.memory_space<vmem>>, %arg8: memref<1x56xf32, #tpu.memory_space<vmem>>, %arg9: memref<2x56xf32, #tpu.memory_space<vmem>>, %arg10: memref<2x8x128xf32, #tpu.memory_space<vmem>>, %arg11: memref<2x256xf32, #tpu.memory_space<vmem>>) attributes {dimension_semantics = [], scalar_prefetch = 0 : i64, scratch_operands = 2 : i64, tpu.core_type = #tpu.core_type<tc>} {
    %c0 = arith.constant 0 : index
    %c0_0 = arith.constant 0 : index
    %c0_1 = arith.constant 0 : index
    %0 = vector.load %arg0[%c0, %c0_0, %c0_1] : memref<2x8x19xf32, #tpu.memory_space<vmem>>, vector<2x8x19xf32>
    %1 = vector.shape_cast %0 : vector<2x8x19xf32> to vector<16x19xf32>
    %c0_2 = arith.constant 0 : index
    %c0_3 = arith.constant 0 : index
    %2 = vector.load %arg1[%c0_2, %c0_3] : memref<19x128xf32, #tpu.memory_space<vmem>>, vector<19x128xf32>
    %cst = arith.constant dense<0.000000e+00> : vector<16x128xf32>
    %3 = tpu.matmul %1, %2, %cst {dimension_numbers = #tpu.dot_dimension_numbers<[1], [0], [0], [1], [0, 0, 1, 1], [], []>} : vector<16x19xf32>, vector<19x128xf32>, vector<16x128xf32> -> vector<16x128xf32>
    %c0_4 = arith.constant 0 : index
    %c0_5 = arith.constant 0 : index
    %4 = vector.load %arg2[%c0_4, %c0_5] : memref<1x128xf32, #tpu.memory_space<vmem>>, vector<1x128xf32>
    %5 = vector.broadcast %4 : vector<1x128xf32> to vector<16x128xf32>
    %6 = arith.addf %3, %5 : vector<16x128xf32>
    %7 = vector.shape_cast %6 : vector<16x128xf32> to vector<2x8x128xf32>
    %c0_6 = arith.constant 0 : index
    %c0_7 = arith.constant 0 : index
    %c0_8 = arith.constant 0 : index
    %8 = vector.load %arg10[%c0_6, %c0_7, %c0_8] : memref<2x8x128xf32, #tpu.memory_space<vmem>>, vector<2x8x128xf32>
    tpu.vector_store %arg10[%c0_6, %c0_7, %c0_8], %7 {strides = array<i32>} : memref<2x8x128xf32, #tpu.memory_space<vmem>>, vector<2x8x128xf32>,
    %c0_9 = arith.constant 0 : index
    %c0_10 = arith.constant 0 : index
    %9 = vector.load %arg6[%c0_9, %c0_10] : memref<1x128xf32, #tpu.memory_space<vmem>>, vector<1x128xf32>
    %10 = vector.shape_cast %9 : vector<1x128xf32> to vector<1x128xf32>
    %11 = vector.broadcast %10 : vector<1x128xf32> to vector<2x128xf32>
    %cst_11 = arith.constant 0.000000e+00 : f32
    %12 = vector.broadcast %cst_11 : f32 to vector<2x32xf32>
    %c0_12 = arith.constant 0 : index
    %c0_13 = arith.constant 0 : index
    %c0_14 = arith.constant 0 : index
    %13 = vector.load %arg10[%c0_12, %c0_13, %c0_14] : memref<2x8x128xf32, #tpu.memory_space<vmem>>, vector<2x1x128xf32>
    %14 = vector.shape_cast %13 : vector<2x1x128xf32> to vector<2x128xf32>
    %c0_15 = arith.constant 0 : index
    %c0_16 = arith.constant 0 : index
    %15 = vector.load %arg3[%c0_15, %c0_16] : memref<32x128xf32, #tpu.memory_space<vmem>>, vector<32x128xf32>
    %cst_17 = arith.constant dense<0.000000e+00> : vector<2x128xf32>
    %16 = tpu.matmul %12, %15, %cst_17 {dimension_numbers = #tpu.dot_dimension_numbers<[1], [0], [0], [1], [0, 0, 1, 1], [], []>} : vector<2x32xf32>, vector<32x128xf32>, vector<2x128xf32> -> vector<2x128xf32>
    %17 = arith.addf %14, %16 : vector<2x128xf32>
    %18 = arith.negf %17 : vector<2x128xf32>
    %19 = math.exp %18 : vector<2x128xf32>
    %cst_18 = arith.constant 1.000000e+00 : f32
    %20 = vector.broadcast %cst_18 : f32 to vector<2x128xf32>
    %21 = arith.addf %20, %19 : vector<2x128xf32>
    %22 = arith.divf %20, %21 : vector<2x128xf32>
    %23 = vector.extract_strided_slice %22 {offsets = [0, 0], sizes = [2, 32], strides = [1, 1]} : vector<2x128xf32> to vector<2x32xf32>
    %24 = vector.extract_strided_slice %22 {offsets = [0, 32], sizes = [2, 32], strides = [1, 1]} : vector<2x128xf32> to vector<2x32xf32>
    %25 = vector.extract_strided_slice %22 {offsets = [0, 64], sizes = [2, 32], strides = [1, 1]} : vector<2x128xf32> to vector<2x32xf32>
    %cst_19 = arith.constant 2.000000e+00 : f32
    %26 = vector.broadcast %cst_19 : f32 to vector<2x32xf32>
    %27 = arith.mulf %26, %25 : vector<2x32xf32>
    %cst_20 = arith.constant 1.000000e+00 : f32
    %28 = vector.broadcast %cst_20 : f32 to vector<2x32xf32>
    %29 = arith.subf %27, %28 : vector<2x32xf32>
    %30 = vector.extract_strided_slice %22 {offsets = [0, 96], sizes = [2, 32], strides = [1, 1]} : vector<2x128xf32> to vector<2x32xf32>
    %31 = arith.mulf %24, %12 : vector<2x32xf32>
    %32 = arith.mulf %23, %29 : vector<2x32xf32>
    %33 = arith.addf %31, %32 : vector<2x32xf32>
    %34 = math.tanh %33 : vector<2x32xf32>
    %35 = arith.mulf %30, %34 : vector<2x32xf32>
    %c0_21 = arith.constant 0 : index
    %c0_22 = arith.constant 0 : index
    %36 = vector.load %arg4[%c0_21, %c0_22] : memref<32x128xf32, #tpu.memory_space<vmem>>, vector<32x128xf32>
    %cst_23 = arith.constant dense<0.000000e+00> : vector<2x128xf32>
    %37 = tpu.matmul %35, %36, %cst_23 {dimension_numbers = #tpu.dot_dimension_numbers<[1], [0], [0], [1], [0, 0, 1, 1], [], []>} : vector<2x32xf32>, vector<32x128xf32>, vector<2x128xf32> -> vector<2x128xf32>
    %c0_24 = arith.constant 0 : index
    %c0_25 = arith.constant 0 : index
    %38 = vector.load %arg5[%c0_24, %c0_25] : memref<32x128xf32, #tpu.memory_space<vmem>>, vector<32x128xf32>
    %cst_26 = arith.constant dense<0.000000e+00> : vector<2x128xf32>
    %39 = tpu.matmul %12, %38, %cst_26 {dimension_numbers = #tpu.dot_dimension_numbers<[1], [0], [0], [1], [0, 0, 1, 1], [], []>} : vector<2x32xf32>, vector<32x128xf32>, vector<2x128xf32> -> vector<2x128xf32>
    %40 = arith.addf %37, %39 : vector<2x128xf32>
    %41 = arith.addf %40, %11 : vector<2x128xf32>
    %42 = arith.negf %41 : vector<2x128xf32>
    %43 = math.exp %42 : vector<2x128xf32>
    %cst_27 = arith.constant 1.000000e+00 : f32
    %44 = vector.broadcast %cst_27 : f32 to vector<2x128xf32>
    %45 = arith.addf %44, %43 : vector<2x128xf32>
    %46 = arith.divf %44, %45 : vector<2x128xf32>
    %47 = vector.extract_strided_slice %46 {offsets = [0, 0], sizes = [2, 32], strides = [1, 1]} : vector<2x128xf32> to vector<2x32xf32>
    %48 = vector.extract_strided_slice %46 {offsets = [0, 32], sizes = [2, 32], strides = [1, 1]} : vector<2x128xf32> to vector<2x32xf32>
    %49 = vector.extract_strided_slice %46 {offsets = [0, 64], sizes = [2, 32], strides = [1, 1]} : vector<2x128xf32> to vector<2x32xf32>
    %cst_28 = arith.constant 2.000000e+00 : f32
    %50 = vector.broadcast %cst_28 : f32 to vector<2x32xf32>
    %51 = arith.mulf %50, %49 : vector<2x32xf32>
    %cst_29 = arith.constant 1.000000e+00 : f32
    %52 = vector.broadcast %cst_29 : f32 to vector<2x32xf32>
    %53 = arith.subf %51, %52 : vector<2x32xf32>
    %54 = vector.extract_strided_slice %46 {offsets = [0, 96], sizes = [2, 32], strides = [1, 1]} : vector<2x128xf32> to vector<2x32xf32>
    %55 = arith.mulf %48, %12 : vector<2x32xf32>
    %56 = arith.mulf %47, %53 : vector<2x32xf32>
    %57 = arith.addf %55, %56 : vector<2x32xf32>
    %58 = math.tanh %57 : vector<2x32xf32>
    %59 = arith.mulf %54, %58 : vector<2x32xf32>
    %c0_30 = arith.constant 0 : index
    %c0_31 = arith.constant 0 : index
    %60 = vector.load %arg11[%c0_30, %c0_31] : memref<2x256xf32, #tpu.memory_space<vmem>>, vector<2x32xf32>
    tpu.vector_store %arg11[%c0_30, %c0_31], %59 {strides = array<i32>} : memref<2x256xf32, #tpu.memory_space<vmem>>, vector<2x32xf32>,
    %c0_32 = arith.constant 0 : index
    %c1 = arith.constant 1 : index
    %c0_33 = arith.constant 0 : index
    %61 = vector.load %arg10[%c0_32, %c1, %c0_33] : memref<2x8x128xf32, #tpu.memory_space<vmem>>, vector<2x1x128xf32>
    %62 = vector.shape_cast %61 : vector<2x1x128xf32> to vector<2x128xf32>
    %c0_34 = arith.constant 0 : index
    %c0_35 = arith.constant 0 : index
    %63 = vector.load %arg3[%c0_34, %c0_35] : memref<32x128xf32, #tpu.memory_space<vmem>>, vector<32x128xf32>
    %cst_36 = arith.constant dense<0.000000e+00> : vector<2x128xf32>
    %64 = tpu.matmul %35, %63, %cst_36 {dimension_numbers = #tpu.dot_dimension_numbers<[1], [0], [0], [1], [0, 0, 1, 1], [], []>} : vector<2x32xf32>, vector<32x128xf32>, vector<2x128xf32> -> vector<2x128xf32>
    %65 = arith.addf %62, %64 : vector<2x128xf32>
    %66 = arith.negf %65 : vector<2x128xf32>
    %67 = math.exp %66 : vector<2x128xf32>
    %cst_37 = arith.constant 1.000000e+00 : f32
    %68 = vector.broadcast %cst_37 : f32 to vector<2x128xf32>
    %69 = arith.addf %68, %67 : vector<2x128xf32>
    %70 = arith.divf %68, %69 : vector<2x128xf32>
    %71 = vector.extract_strided_slice %70 {offsets = [0, 0], sizes = [2, 32], strides = [1, 1]} : vector<2x128xf32> to vector<2x32xf32>
    %72 = vector.extract_strided_slice %70 {offsets = [0, 32], sizes = [2, 32], strides = [1, 1]} : vector<2x128xf32> to vector<2x32xf32>
    %73 = vector.extract_strided_slice %70 {offsets = [0, 64], sizes = [2, 32], strides = [1, 1]} : vector<2x128xf32> to vector<2x32xf32>
    %cst_38 = arith.constant 2.000000e+00 : f32
    %74 = vector.broadcast %cst_38 : f32 to vector<2x32xf32>
    %75 = arith.mulf %74, %73 : vector<2x32xf32>
    %cst_39 = arith.constant 1.000000e+00 : f32
    %76 = vector.broadcast %cst_39 : f32 to vector<2x32xf32>
    %77 = arith.subf %75, %76 : vector<2x32xf32>
    %78 = vector.extract_strided_slice %70 {offsets = [0, 96], sizes = [2, 32], strides = [1, 1]} : vector<2x128xf32> to vector<2x32xf32>
    %79 = arith.mulf %72, %33 : vector<2x32xf32>
    %80 = arith.mulf %71, %77 : vector<2x32xf32>
    %81 = arith.addf %79, %80 : vector<2x32xf32>
    %82 = math.tanh %81 : vector<2x32xf32>
    %83 = arith.mulf %78, %82 : vector<2x32xf32>
    %c0_40 = arith.constant 0 : index
    %c0_41 = arith.constant 0 : index
    %84 = vector.load %arg4[%c0_40, %c0_41] : memref<32x128xf32, #tpu.memory_space<vmem>>, vector<32x128xf32>
    %cst_42 = arith.constant dense<0.000000e+00> : vector<2x128xf32>
    %85 = tpu.matmul %83, %84, %cst_42 {dimension_numbers = #tpu.dot_dimension_numbers<[1], [0], [0], [1], [0, 0, 1, 1], [], []>} : vector<2x32xf32>, vector<32x128xf32>, vector<2x128xf32> -> vector<2x128xf32>
    %c0_43 = arith.constant 0 : index
    %c0_44 = arith.constant 0 : index
    %86 = vector.load %arg5[%c0_43, %c0_44] : memref<32x128xf32, #tpu.memory_space<vmem>>, vector<32x128xf32>
    %cst_45 = arith.constant dense<0.000000e+00> : vector<2x128xf32>
    %87 = tpu.matmul %59, %86, %cst_45 {dimension_numbers = #tpu.dot_dimension_numbers<[1], [0], [0], [1], [0, 0, 1, 1], [], []>} : vector<2x32xf32>, vector<32x128xf32>, vector<2x128xf32> -> vector<2x128xf32>
    %88 = arith.addf %85, %87 : vector<2x128xf32>
    %89 = arith.addf %88, %11 : vector<2x128xf32>
    %90 = arith.negf %89 : vector<2x128xf32>
    %91 = math.exp %90 : vector<2x128xf32>
    %cst_46 = arith.constant 1.000000e+00 : f32
    %92 = vector.broadcast %cst_46 : f32 to vector<2x128xf32>
    %93 = arith.addf %92, %91 : vector<2x128xf32>
    %94 = arith.divf %92, %93 : vector<2x128xf32>
    %95 = vector.extract_strided_slice %94 {offsets = [0, 0], sizes = [2, 32], strides = [1, 1]} : vector<2x128xf32> to vector<2x32xf32>
    %96 = vector.extract_strided_slice %94 {offsets = [0, 32], sizes = [2, 32], strides = [1, 1]} : vector<2x128xf32> to vector<2x32xf32>
    %97 = vector.extract_strided_slice %94 {offsets = [0, 64], sizes = [2, 32], strides = [1, 1]} : vector<2x128xf32> to vector<2x32xf32>
    %cst_47 = arith.constant 2.000000e+00 : f32
    %98 = vector.broadcast %cst_47 : f32 to vector<2x32xf32>
    %99 = arith.mulf %98, %97 : vector<2x32xf32>
    %cst_48 = arith.constant 1.000000e+00 : f32
    %100 = vector.broadcast %cst_48 : f32 to vector<2x32xf32>
    %101 = arith.subf %99, %100 : vector<2x32xf32>
    %102 = vector.extract_strided_slice %94 {offsets = [0, 96], sizes = [2, 32], strides = [1, 1]} : vector<2x128xf32> to vector<2x32xf32>
    %103 = arith.mulf %96, %57 : vector<2x32xf32>
    %104 = arith.mulf %95, %101 : vector<2x32xf32>
    %105 = arith.addf %103, %104 : vector<2x32xf32>
    %106 = math.tanh %105 : vector<2x32xf32>
    %107 = arith.mulf %102, %106 : vector<2x32xf32>
    %c0_49 = arith.constant 0 : index
    %c32 = arith.constant 32 : index
    %108 = vector.load %arg11[%c0_49, %c32] : memref<2x256xf32, #tpu.memory_space<vmem>>, vector<2x32xf32>
    tpu.vector_store %arg11[%c0_49, %c32], %107 {strides = array<i32>} : memref<2x256xf32, #tpu.memory_space<vmem>>, vector<2x32xf32>,
    %c0_50 = arith.constant 0 : index
    %c2 = arith.constant 2 : index
    %c0_51 = arith.constant 0 : index
    %109 = vector.load %arg10[%c0_50, %c2, %c0_51] : memref<2x8x128xf32, #tpu.memory_space<vmem>>, vector<2x1x128xf32>
    %110 = vector.shape_cast %109 : vector<2x1x128xf32> to vector<2x128xf32>
    %c0_52 = arith.constant 0 : index
    %c0_53 = arith.constant 0 : index
    %111 = vector.load %arg3[%c0_52, %c0_53] : memref<32x128xf32, #tpu.memory_space<vmem>>, vector<32x128xf32>
    %cst_54 = arith.constant dense<0.000000e+00> : vector<2x128xf32>
    %112 = tpu.matmul %83, %111, %cst_54 {dimension_numbers = #tpu.dot_dimension_numbers<[1], [0], [0], [1], [0, 0, 1, 1], [], []>} : vector<2x32xf32>, vector<32x128xf32>, vector<2x128xf32> -> vector<2x128xf32>
    %113 = arith.addf %110, %112 : vector<2x128xf32>
    %114 = arith.negf %113 : vector<2x128xf32>
    %115 = math.exp %114 : vector<2x128xf32>
    %cst_55 = arith.constant 1.000000e+00 : f32
    %116 = vector.broadcast %cst_55 : f32 to vector<2x128xf32>
    %117 = arith.addf %116, %115 : vector<2x128xf32>
    %118 = arith.divf %116, %117 : vector<2x128xf32>
    %119 = vector.extract_strided_slice %118 {offsets = [0, 0], sizes = [2, 32], strides = [1, 1]} : vector<2x128xf32> to vector<2x32xf32>
    %120 = vector.extract_strided_slice %118 {offsets = [0, 32], sizes = [2, 32], strides = [1, 1]} : vector<2x128xf32> to vector<2x32xf32>
    %121 = vector.extract_strided_slice %118 {offsets = [0, 64], sizes = [2, 32], strides = [1, 1]} : vector<2x128xf32> to vector<2x32xf32>
    %cst_56 = arith.constant 2.000000e+00 : f32
    %122 = vector.broadcast %cst_56 : f32 to vector<2x32xf32>
    %123 = arith.mulf %122, %121 : vector<2x32xf32>
    %cst_57 = arith.constant 1.000000e+00 : f32
    %124 = vector.broadcast %cst_57 : f32 to vector<2x32xf32>
    %125 = arith.subf %123, %124 : vector<2x32xf32>
    %126 = vector.extract_strided_slice %118 {offsets = [0, 96], sizes = [2, 32], strides = [1, 1]} : vector<2x128xf32> to vector<2x32xf32>
    %127 = arith.mulf %120, %81 : vector<2x32xf32>
    %128 = arith.mulf %119, %125 : vector<2x32xf32>
    %129 = arith.addf %127, %128 : vector<2x32xf32>
    %130 = math.tanh %129 : vector<2x32xf32>
    %131 = arith.mulf %126, %130 : vector<2x32xf32>
    %c0_58 = arith.constant 0 : index
    %c0_59 = arith.constant 0 : index
    %132 = vector.load %arg4[%c0_58, %c0_59] : memref<32x128xf32, #tpu.memory_space<vmem>>, vector<32x128xf32>
    %cst_60 = arith.constant dense<0.000000e+00> : vector<2x128xf32>
    %133 = tpu.matmul %131, %132, %cst_60 {dimension_numbers = #tpu.dot_dimension_numbers<[1], [0], [0], [1], [0, 0, 1, 1], [], []>} : vector<2x32xf32>, vector<32x128xf32>, vector<2x128xf32> -> vector<2x128xf32>
    %c0_61 = arith.constant 0 : index
    %c0_62 = arith.constant 0 : index
    %134 = vector.load %arg5[%c0_61, %c0_62] : memref<32x128xf32, #tpu.memory_space<vmem>>, vector<32x128xf32>
    %cst_63 = arith.constant dense<0.000000e+00> : vector<2x128xf32>
    %135 = tpu.matmul %107, %134, %cst_63 {dimension_numbers = #tpu.dot_dimension_numbers<[1], [0], [0], [1], [0, 0, 1, 1], [], []>} : vector<2x32xf32>, vector<32x128xf32>, vector<2x128xf32> -> vector<2x128xf32>
    %136 = arith.addf %133, %135 : vector<2x128xf32>
    %137 = arith.addf %136, %11 : vector<2x128xf32>
    %138 = arith.negf %137 : vector<2x128xf32>
    %139 = math.exp %138 : vector<2x128xf32>
    %cst_64 = arith.constant 1.000000e+00 : f32
    %140 = vector.broadcast %cst_64 : f32 to vector<2x128xf32>
    %141 = arith.addf %140, %139 : vector<2x128xf32>
    %142 = arith.divf %140, %141 : vector<2x128xf32>
    %143 = vector.extract_strided_slice %142 {offsets = [0, 0], sizes = [2, 32], strides = [1, 1]} : vector<2x128xf32> to vector<2x32xf32>
    %144 = vector.extract_strided_slice %142 {offsets = [0, 32], sizes = [2, 32], strides = [1, 1]} : vector<2x128xf32> to vector<2x32xf32>
    %145 = vector.extract_strided_slice %142 {offsets = [0, 64], sizes = [2, 32], strides = [1, 1]} : vector<2x128xf32> to vector<2x32xf32>
    %cst_65 = arith.constant 2.000000e+00 : f32
    %146 = vector.broadcast %cst_65 : f32 to vector<2x32xf32>
    %147 = arith.mulf %146, %145 : vector<2x32xf32>
    %cst_66 = arith.constant 1.000000e+00 : f32
    %148 = vector.broadcast %cst_66 : f32 to vector<2x32xf32>
    %149 = arith.subf %147, %148 : vector<2x32xf32>
    %150 = vector.extract_strided_slice %142 {offsets = [0, 96], sizes = [2, 32], strides = [1, 1]} : vector<2x128xf32> to vector<2x32xf32>
    %151 = arith.mulf %144, %105 : vector<2x32xf32>
    %152 = arith.mulf %143, %149 : vector<2x32xf32>
    %153 = arith.addf %151, %152 : vector<2x32xf32>
    %154 = math.tanh %153 : vector<2x32xf32>
    %155 = arith.mulf %150, %154 : vector<2x32xf32>
    %c0_67 = arith.constant 0 : index
    %c64 = arith.constant 64 : index
    %156 = vector.load %arg11[%c0_67, %c64] : memref<2x256xf32, #tpu.memory_space<vmem>>, vector<2x32xf32>
    tpu.vector_store %arg11[%c0_67, %c64], %155 {strides = array<i32>} : memref<2x256xf32, #tpu.memory_space<vmem>>, vector<2x32xf32>,
    %c0_68 = arith.constant 0 : index
    %c3 = arith.constant 3 : index
    %c0_69 = arith.constant 0 : index
    %157 = vector.load %arg10[%c0_68, %c3, %c0_69] : memref<2x8x128xf32, #tpu.memory_space<vmem>>, vector<2x1x128xf32>
    %158 = vector.shape_cast %157 : vector<2x1x128xf32> to vector<2x128xf32>
    %c0_70 = arith.constant 0 : index
    %c0_71 = arith.constant 0 : index
    %159 = vector.load %arg3[%c0_70, %c0_71] : memref<32x128xf32, #tpu.memory_space<vmem>>, vector<32x128xf32>
    %cst_72 = arith.constant dense<0.000000e+00> : vector<2x128xf32>
    %160 = tpu.matmul %131, %159, %cst_72 {dimension_numbers = #tpu.dot_dimension_numbers<[1], [0], [0], [1], [0, 0, 1, 1], [], []>} : vector<2x32xf32>, vector<32x128xf32>, vector<2x128xf32> -> vector<2x128xf32>
    %161 = arith.addf %158, %160 : vector<2x128xf32>
    %162 = arith.negf %161 : vector<2x128xf32>
    %163 = math.exp %162 : vector<2x128xf32>
    %cst_73 = arith.constant 1.000000e+00 : f32
    %164 = vector.broadcast %cst_73 : f32 to vector<2x128xf32>
    %165 = arith.addf %164, %163 : vector<2x128xf32>
    %166 = arith.divf %164, %165 : vector<2x128xf32>
    %167 = vector.extract_strided_slice %166 {offsets = [0, 0], sizes = [2, 32], strides = [1, 1]} : vector<2x128xf32> to vector<2x32xf32>
    %168 = vector.extract_strided_slice %166 {offsets = [0, 32], sizes = [2, 32], strides = [1, 1]} : vector<2x128xf32> to vector<2x32xf32>
    %169 = vector.extract_strided_slice %166 {offsets = [0, 64], sizes = [2, 32], strides = [1, 1]} : vector<2x128xf32> to vector<2x32xf32>
    %cst_74 = arith.constant 2.000000e+00 : f32
    %170 = vector.broadcast %cst_74 : f32 to vector<2x32xf32>
    %171 = arith.mulf %170, %169 : vector<2x32xf32>
    %cst_75 = arith.constant 1.000000e+00 : f32
    %172 = vector.broadcast %cst_75 : f32 to vector<2x32xf32>
    %173 = arith.subf %171, %172 : vector<2x32xf32>
    %174 = vector.extract_strided_slice %166 {offsets = [0, 96], sizes = [2, 32], strides = [1, 1]} : vector<2x128xf32> to vector<2x32xf32>
    %175 = arith.mulf %168, %129 : vector<2x32xf32>
    %176 = arith.mulf %167, %173 : vector<2x32xf32>
    %177 = arith.addf %175, %176 : vector<2x32xf32>
    %178 = math.tanh %177 : vector<2x32xf32>
    %179 = arith.mulf %174, %178 : vector<2x32xf32>
    %c0_76 = arith.constant 0 : index
    %c0_77 = arith.constant 0 : index
    %180 = vector.load %arg4[%c0_76, %c0_77] : memref<32x128xf32, #tpu.memory_space<vmem>>, vector<32x128xf32>
    %cst_78 = arith.constant dense<0.000000e+00> : vector<2x128xf32>
    %181 = tpu.matmul %179, %180, %cst_78 {dimension_numbers = #tpu.dot_dimension_numbers<[1], [0], [0], [1], [0, 0, 1, 1], [], []>} : vector<2x32xf32>, vector<32x128xf32>, vector<2x128xf32> -> vector<2x128xf32>
    %c0_79 = arith.constant 0 : index
    %c0_80 = arith.constant 0 : index
    %182 = vector.load %arg5[%c0_79, %c0_80] : memref<32x128xf32, #tpu.memory_space<vmem>>, vector<32x128xf32>
    %cst_81 = arith.constant dense<0.000000e+00> : vector<2x128xf32>
    %183 = tpu.matmul %155, %182, %cst_81 {dimension_numbers = #tpu.dot_dimension_numbers<[1], [0], [0], [1], [0, 0, 1, 1], [], []>} : vector<2x32xf32>, vector<32x128xf32>, vector<2x128xf32> -> vector<2x128xf32>
    %184 = arith.addf %181, %183 : vector<2x128xf32>
    %185 = arith.addf %184, %11 : vector<2x128xf32>
    %186 = arith.negf %185 : vector<2x128xf32>
    %187 = math.exp %186 : vector<2x128xf32>
    %cst_82 = arith.constant 1.000000e+00 : f32
    %188 = vector.broadcast %cst_82 : f32 to vector<2x128xf32>
    %189 = arith.addf %188, %187 : vector<2x128xf32>
    %190 = arith.divf %188, %189 : vector<2x128xf32>
    %191 = vector.extract_strided_slice %190 {offsets = [0, 0], sizes = [2, 32], strides = [1, 1]} : vector<2x128xf32> to vector<2x32xf32>
    %192 = vector.extract_strided_slice %190 {offsets = [0, 32], sizes = [2, 32], strides = [1, 1]} : vector<2x128xf32> to vector<2x32xf32>
    %193 = vector.extract_strided_slice %190 {offsets = [0, 64], sizes = [2, 32], strides = [1, 1]} : vector<2x128xf32> to vector<2x32xf32>
    %cst_83 = arith.constant 2.000000e+00 : f32
    %194 = vector.broadcast %cst_83 : f32 to vector<2x32xf32>
    %195 = arith.mulf %194, %193 : vector<2x32xf32>
    %cst_84 = arith.constant 1.000000e+00 : f32
    %196 = vector.broadcast %cst_84 : f32 to vector<2x32xf32>
    %197 = arith.subf %195, %196 : vector<2x32xf32>
    %198 = vector.extract_strided_slice %190 {offsets = [0, 96], sizes = [2, 32], strides = [1, 1]} : vector<2x128xf32> to vector<2x32xf32>
    %199 = arith.mulf %192, %153 : vector<2x32xf32>
    %200 = arith.mulf %191, %197 : vector<2x32xf32>
    %201 = arith.addf %199, %200 : vector<2x32xf32>
    %202 = math.tanh %201 : vector<2x32xf32>
    %203 = arith.mulf %198, %202 : vector<2x32xf32>
    %c0_85 = arith.constant 0 : index
    %c96 = arith.constant 96 : index
    %204 = vector.load %arg11[%c0_85, %c96] : memref<2x256xf32, #tpu.memory_space<vmem>>, vector<2x32xf32>
    tpu.vector_store %arg11[%c0_85, %c96], %203 {strides = array<i32>} : memref<2x256xf32, #tpu.memory_space<vmem>>, vector<2x32xf32>,
    %c0_86 = arith.constant 0 : index
    %c4 = arith.constant 4 : index
    %c0_87 = arith.constant 0 : index
    %205 = vector.load %arg10[%c0_86, %c4, %c0_87] : memref<2x8x128xf32, #tpu.memory_space<vmem>>, vector<2x1x128xf32>
    %206 = vector.shape_cast %205 : vector<2x1x128xf32> to vector<2x128xf32>
    %c0_88 = arith.constant 0 : index
    %c0_89 = arith.constant 0 : index
    %207 = vector.load %arg3[%c0_88, %c0_89] : memref<32x128xf32, #tpu.memory_space<vmem>>, vector<32x128xf32>
    %cst_90 = arith.constant dense<0.000000e+00> : vector<2x128xf32>
    %208 = tpu.matmul %179, %207, %cst_90 {dimension_numbers = #tpu.dot_dimension_numbers<[1], [0], [0], [1], [0, 0, 1, 1], [], []>} : vector<2x32xf32>, vector<32x128xf32>, vector<2x128xf32> -> vector<2x128xf32>
    %209 = arith.addf %206, %208 : vector<2x128xf32>
    %210 = arith.negf %209 : vector<2x128xf32>
    %211 = math.exp %210 : vector<2x128xf32>
    %cst_91 = arith.constant 1.000000e+00 : f32
    %212 = vector.broadcast %cst_91 : f32 to vector<2x128xf32>
    %213 = arith.addf %212, %211 : vector<2x128xf32>
    %214 = arith.divf %212, %213 : vector<2x128xf32>
    %215 = vector.extract_strided_slice %214 {offsets = [0, 0], sizes = [2, 32], strides = [1, 1]} : vector<2x128xf32> to vector<2x32xf32>
    %216 = vector.extract_strided_slice %214 {offsets = [0, 32], sizes = [2, 32], strides = [1, 1]} : vector<2x128xf32> to vector<2x32xf32>
    %217 = vector.extract_strided_slice %214 {offsets = [0, 64], sizes = [2, 32], strides = [1, 1]} : vector<2x128xf32> to vector<2x32xf32>
    %cst_92 = arith.constant 2.000000e+00 : f32
    %218 = vector.broadcast %cst_92 : f32 to vector<2x32xf32>
    %219 = arith.mulf %218, %217 : vector<2x32xf32>
    %cst_93 = arith.constant 1.000000e+00 : f32
    %220 = vector.broadcast %cst_93 : f32 to vector<2x32xf32>
    %221 = arith.subf %219, %220 : vector<2x32xf32>
    %222 = vector.extract_strided_slice %214 {offsets = [0, 96], sizes = [2, 32], strides = [1, 1]} : vector<2x128xf32> to vector<2x32xf32>
    %223 = arith.mulf %216, %177 : vector<2x32xf32>
    %224 = arith.mulf %215, %221 : vector<2x32xf32>
    %225 = arith.addf %223, %224 : vector<2x32xf32>
    %226 = math.tanh %225 : vector<2x32xf32>
    %227 = arith.mulf %222, %226 : vector<2x32xf32>
    %c0_94 = arith.constant 0 : index
    %c0_95 = arith.constant 0 : index
    %228 = vector.load %arg4[%c0_94, %c0_95] : memref<32x128xf32, #tpu.memory_space<vmem>>, vector<32x128xf32>
    %cst_96 = arith.constant dense<0.000000e+00> : vector<2x128xf32>
    %229 = tpu.matmul %227, %228, %cst_96 {dimension_numbers = #tpu.dot_dimension_numbers<[1], [0], [0], [1], [0, 0, 1, 1], [], []>} : vector<2x32xf32>, vector<32x128xf32>, vector<2x128xf32> -> vector<2x128xf32>
    %c0_97 = arith.constant 0 : index
    %c0_98 = arith.constant 0 : index
    %230 = vector.load %arg5[%c0_97, %c0_98] : memref<32x128xf32, #tpu.memory_space<vmem>>, vector<32x128xf32>
    %cst_99 = arith.constant dense<0.000000e+00> : vector<2x128xf32>
    %231 = tpu.matmul %203, %230, %cst_99 {dimension_numbers = #tpu.dot_dimension_numbers<[1], [0], [0], [1], [0, 0, 1, 1], [], []>} : vector<2x32xf32>, vector<32x128xf32>, vector<2x128xf32> -> vector<2x128xf32>
    %232 = arith.addf %229, %231 : vector<2x128xf32>
    %233 = arith.addf %232, %11 : vector<2x128xf32>
    %234 = arith.negf %233 : vector<2x128xf32>
    %235 = math.exp %234 : vector<2x128xf32>
    %cst_100 = arith.constant 1.000000e+00 : f32
    %236 = vector.broadcast %cst_100 : f32 to vector<2x128xf32>
    %237 = arith.addf %236, %235 : vector<2x128xf32>
    %238 = arith.divf %236, %237 : vector<2x128xf32>
    %239 = vector.extract_strided_slice %238 {offsets = [0, 0], sizes = [2, 32], strides = [1, 1]} : vector<2x128xf32> to vector<2x32xf32>
    %240 = vector.extract_strided_slice %238 {offsets = [0, 32], sizes = [2, 32], strides = [1, 1]} : vector<2x128xf32> to vector<2x32xf32>
    %241 = vector.extract_strided_slice %238 {offsets = [0, 64], sizes = [2, 32], strides = [1, 1]} : vector<2x128xf32> to vector<2x32xf32>
    %cst_101 = arith.constant 2.000000e+00 : f32
    %242 = vector.broadcast %cst_101 : f32 to vector<2x32xf32>
    %243 = arith.mulf %242, %241 : vector<2x32xf32>
    %cst_102 = arith.constant 1.000000e+00 : f32
    %244 = vector.broadcast %cst_102 : f32 to vector<2x32xf32>
    %245 = arith.subf %243, %244 : vector<2x32xf32>
    %246 = vector.extract_strided_slice %238 {offsets = [0, 96], sizes = [2, 32], strides = [1, 1]} : vector<2x128xf32> to vector<2x32xf32>
    %247 = arith.mulf %240, %201 : vector<2x32xf32>
    %248 = arith.mulf %239, %245 : vector<2x32xf32>
    %249 = arith.addf %247, %248 : vector<2x32xf32>
    %250 = math.tanh %249 : vector<2x32xf32>
    %251 = arith.mulf %246, %250 : vector<2x32xf32>
    %c0_103 = arith.constant 0 : index
    %c128 = arith.constant 128 : index
    %252 = vector.load %arg11[%c0_103, %c128] : memref<2x256xf32, #tpu.memory_space<vmem>>, vector<2x32xf32>
    tpu.vector_store %arg11[%c0_103, %c128], %251 {strides = array<i32>} : memref<2x256xf32, #tpu.memory_space<vmem>>, vector<2x32xf32>,
    %c0_104 = arith.constant 0 : index
    %c5 = arith.constant 5 : index
    %c0_105 = arith.constant 0 : index
    %253 = vector.load %arg10[%c0_104, %c5, %c0_105] : memref<2x8x128xf32, #tpu.memory_space<vmem>>, vector<2x1x128xf32>
    %254 = vector.shape_cast %253 : vector<2x1x128xf32> to vector<2x128xf32>
    %c0_106 = arith.constant 0 : index
    %c0_107 = arith.constant 0 : index
    %255 = vector.load %arg3[%c0_106, %c0_107] : memref<32x128xf32, #tpu.memory_space<vmem>>, vector<32x128xf32>
    %cst_108 = arith.constant dense<0.000000e+00> : vector<2x128xf32>
    %256 = tpu.matmul %227, %255, %cst_108 {dimension_numbers = #tpu.dot_dimension_numbers<[1], [0], [0], [1], [0, 0, 1, 1], [], []>} : vector<2x32xf32>, vector<32x128xf32>, vector<2x128xf32> -> vector<2x128xf32>
    %257 = arith.addf %254, %256 : vector<2x128xf32>
    %258 = arith.negf %257 : vector<2x128xf32>
    %259 = math.exp %258 : vector<2x128xf32>
    %cst_109 = arith.constant 1.000000e+00 : f32
    %260 = vector.broadcast %cst_109 : f32 to vector<2x128xf32>
    %261 = arith.addf %260, %259 : vector<2x128xf32>
    %262 = arith.divf %260, %261 : vector<2x128xf32>
    %263 = vector.extract_strided_slice %262 {offsets = [0, 0], sizes = [2, 32], strides = [1, 1]} : vector<2x128xf32> to vector<2x32xf32>
    %264 = vector.extract_strided_slice %262 {offsets = [0, 32], sizes = [2, 32], strides = [1, 1]} : vector<2x128xf32> to vector<2x32xf32>
    %265 = vector.extract_strided_slice %262 {offsets = [0, 64], sizes = [2, 32], strides = [1, 1]} : vector<2x128xf32> to vector<2x32xf32>
    %cst_110 = arith.constant 2.000000e+00 : f32
    %266 = vector.broadcast %cst_110 : f32 to vector<2x32xf32>
    %267 = arith.mulf %266, %265 : vector<2x32xf32>
    %cst_111 = arith.constant 1.000000e+00 : f32
    %268 = vector.broadcast %cst_111 : f32 to vector<2x32xf32>
    %269 = arith.subf %267, %268 : vector<2x32xf32>
    %270 = vector.extract_strided_slice %262 {offsets = [0, 96], sizes = [2, 32], strides = [1, 1]} : vector<2x128xf32> to vector<2x32xf32>
    %271 = arith.mulf %264, %225 : vector<2x32xf32>
    %272 = arith.mulf %263, %269 : vector<2x32xf32>
    %273 = arith.addf %271, %272 : vector<2x32xf32>
    %274 = math.tanh %273 : vector<2x32xf32>
    %275 = arith.mulf %270, %274 : vector<2x32xf32>
    %c0_112 = arith.constant 0 : index
    %c0_113 = arith.constant 0 : index
    %276 = vector.load %arg4[%c0_112, %c0_113] : memref<32x128xf32, #tpu.memory_space<vmem>>, vector<32x128xf32>
    %cst_114 = arith.constant dense<0.000000e+00> : vector<2x128xf32>
    %277 = tpu.matmul %275, %276, %cst_114 {dimension_numbers = #tpu.dot_dimension_numbers<[1], [0], [0], [1], [0, 0, 1, 1], [], []>} : vector<2x32xf32>, vector<32x128xf32>, vector<2x128xf32> -> vector<2x128xf32>
    %c0_115 = arith.constant 0 : index
    %c0_116 = arith.constant 0 : index
    %278 = vector.load %arg5[%c0_115, %c0_116] : memref<32x128xf32, #tpu.memory_space<vmem>>, vector<32x128xf32>
    %cst_117 = arith.constant dense<0.000000e+00> : vector<2x128xf32>
    %279 = tpu.matmul %251, %278, %cst_117 {dimension_numbers = #tpu.dot_dimension_numbers<[1], [0], [0], [1], [0, 0, 1, 1], [], []>} : vector<2x32xf32>, vector<32x128xf32>, vector<2x128xf32> -> vector<2x128xf32>
    %280 = arith.addf %277, %279 : vector<2x128xf32>
    %281 = arith.addf %280, %11 : vector<2x128xf32>
    %282 = arith.negf %281 : vector<2x128xf32>
    %283 = math.exp %282 : vector<2x128xf32>
    %cst_118 = arith.constant 1.000000e+00 : f32
    %284 = vector.broadcast %cst_118 : f32 to vector<2x128xf32>
    %285 = arith.addf %284, %283 : vector<2x128xf32>
    %286 = arith.divf %284, %285 : vector<2x128xf32>
    %287 = vector.extract_strided_slice %286 {offsets = [0, 0], sizes = [2, 32], strides = [1, 1]} : vector<2x128xf32> to vector<2x32xf32>
    %288 = vector.extract_strided_slice %286 {offsets = [0, 32], sizes = [2, 32], strides = [1, 1]} : vector<2x128xf32> to vector<2x32xf32>
    %289 = vector.extract_strided_slice %286 {offsets = [0, 64], sizes = [2, 32], strides = [1, 1]} : vector<2x128xf32> to vector<2x32xf32>
    %cst_119 = arith.constant 2.000000e+00 : f32
    %290 = vector.broadcast %cst_119 : f32 to vector<2x32xf32>
    %291 = arith.mulf %290, %289 : vector<2x32xf32>
    %cst_120 = arith.constant 1.000000e+00 : f32
    %292 = vector.broadcast %cst_120 : f32 to vector<2x32xf32>
    %293 = arith.subf %291, %292 : vector<2x32xf32>
    %294 = vector.extract_strided_slice %286 {offsets = [0, 96], sizes = [2, 32], strides = [1, 1]} : vector<2x128xf32> to vector<2x32xf32>
    %295 = arith.mulf %288, %249 : vector<2x32xf32>
    %296 = arith.mulf %287, %293 : vector<2x32xf32>
    %297 = arith.addf %295, %296 : vector<2x32xf32>
    %298 = math.tanh %297 : vector<2x32xf32>
    %299 = arith.mulf %294, %298 : vector<2x32xf32>
    %c0_121 = arith.constant 0 : index
    %c160 = arith.constant 160 : index
    %300 = vector.load %arg11[%c0_121, %c160] : memref<2x256xf32, #tpu.memory_space<vmem>>, vector<2x32xf32>
    tpu.vector_store %arg11[%c0_121, %c160], %299 {strides = array<i32>} : memref<2x256xf32, #tpu.memory_space<vmem>>, vector<2x32xf32>,
    %c0_122 = arith.constant 0 : index
    %c6 = arith.constant 6 : index
    %c0_123 = arith.constant 0 : index
    %301 = vector.load %arg10[%c0_122, %c6, %c0_123] : memref<2x8x128xf32, #tpu.memory_space<vmem>>, vector<2x1x128xf32>
    %302 = vector.shape_cast %301 : vector<2x1x128xf32> to vector<2x128xf32>
    %c0_124 = arith.constant 0 : index
    %c0_125 = arith.constant 0 : index
    %303 = vector.load %arg3[%c0_124, %c0_125] : memref<32x128xf32, #tpu.memory_space<vmem>>, vector<32x128xf32>
    %cst_126 = arith.constant dense<0.000000e+00> : vector<2x128xf32>
    %304 = tpu.matmul %275, %303, %cst_126 {dimension_numbers = #tpu.dot_dimension_numbers<[1], [0], [0], [1], [0, 0, 1, 1], [], []>} : vector<2x32xf32>, vector<32x128xf32>, vector<2x128xf32> -> vector<2x128xf32>
    %305 = arith.addf %302, %304 : vector<2x128xf32>
    %306 = arith.negf %305 : vector<2x128xf32>
    %307 = math.exp %306 : vector<2x128xf32>
    %cst_127 = arith.constant 1.000000e+00 : f32
    %308 = vector.broadcast %cst_127 : f32 to vector<2x128xf32>
    %309 = arith.addf %308, %307 : vector<2x128xf32>
    %310 = arith.divf %308, %309 : vector<2x128xf32>
    %311 = vector.extract_strided_slice %310 {offsets = [0, 0], sizes = [2, 32], strides = [1, 1]} : vector<2x128xf32> to vector<2x32xf32>
    %312 = vector.extract_strided_slice %310 {offsets = [0, 32], sizes = [2, 32], strides = [1, 1]} : vector<2x128xf32> to vector<2x32xf32>
    %313 = vector.extract_strided_slice %310 {offsets = [0, 64], sizes = [2, 32], strides = [1, 1]} : vector<2x128xf32> to vector<2x32xf32>
    %cst_128 = arith.constant 2.000000e+00 : f32
    %314 = vector.broadcast %cst_128 : f32 to vector<2x32xf32>
    %315 = arith.mulf %314, %313 : vector<2x32xf32>
    %cst_129 = arith.constant 1.000000e+00 : f32
    %316 = vector.broadcast %cst_129 : f32 to vector<2x32xf32>
    %317 = arith.subf %315, %316 : vector<2x32xf32>
    %318 = vector.extract_strided_slice %310 {offsets = [0, 96], sizes = [2, 32], strides = [1, 1]} : vector<2x128xf32> to vector<2x32xf32>
    %319 = arith.mulf %312, %273 : vector<2x32xf32>
    %320 = arith.mulf %311, %317 : vector<2x32xf32>
    %321 = arith.addf %319, %320 : vector<2x32xf32>
    %322 = math.tanh %321 : vector<2x32xf32>
    %323 = arith.mulf %318, %322 : vector<2x32xf32>
    %c0_130 = arith.constant 0 : index
    %c0_131 = arith.constant 0 : index
    %324 = vector.load %arg4[%c0_130, %c0_131] : memref<32x128xf32, #tpu.memory_space<vmem>>, vector<32x128xf32>
    %cst_132 = arith.constant dense<0.000000e+00> : vector<2x128xf32>
    %325 = tpu.matmul %323, %324, %cst_132 {dimension_numbers = #tpu.dot_dimension_numbers<[1], [0], [0], [1], [0, 0, 1, 1], [], []>} : vector<2x32xf32>, vector<32x128xf32>, vector<2x128xf32> -> vector<2x128xf32>
    %c0_133 = arith.constant 0 : index
    %c0_134 = arith.constant 0 : index
    %326 = vector.load %arg5[%c0_133, %c0_134] : memref<32x128xf32, #tpu.memory_space<vmem>>, vector<32x128xf32>
    %cst_135 = arith.constant dense<0.000000e+00> : vector<2x128xf32>
    %327 = tpu.matmul %299, %326, %cst_135 {dimension_numbers = #tpu.dot_dimension_numbers<[1], [0], [0], [1], [0, 0, 1, 1], [], []>} : vector<2x32xf32>, vector<32x128xf32>, vector<2x128xf32> -> vector<2x128xf32>
    %328 = arith.addf %325, %327 : vector<2x128xf32>
    %329 = arith.addf %328, %11 : vector<2x128xf32>
    %330 = arith.negf %329 : vector<2x128xf32>
    %331 = math.exp %330 : vector<2x128xf32>
    %cst_136 = arith.constant 1.000000e+00 : f32
    %332 = vector.broadcast %cst_136 : f32 to vector<2x128xf32>
    %333 = arith.addf %332, %331 : vector<2x128xf32>
    %334 = arith.divf %332, %333 : vector<2x128xf32>
    %335 = vector.extract_strided_slice %334 {offsets = [0, 0], sizes = [2, 32], strides = [1, 1]} : vector<2x128xf32> to vector<2x32xf32>
    %336 = vector.extract_strided_slice %334 {offsets = [0, 32], sizes = [2, 32], strides = [1, 1]} : vector<2x128xf32> to vector<2x32xf32>
    %337 = vector.extract_strided_slice %334 {offsets = [0, 64], sizes = [2, 32], strides = [1, 1]} : vector<2x128xf32> to vector<2x32xf32>
    %cst_137 = arith.constant 2.000000e+00 : f32
    %338 = vector.broadcast %cst_137 : f32 to vector<2x32xf32>
    %339 = arith.mulf %338, %337 : vector<2x32xf32>
    %cst_138 = arith.constant 1.000000e+00 : f32
    %340 = vector.broadcast %cst_138 : f32 to vector<2x32xf32>
    %341 = arith.subf %339, %340 : vector<2x32xf32>
    %342 = vector.extract_strided_slice %334 {offsets = [0, 96], sizes = [2, 32], strides = [1, 1]} : vector<2x128xf32> to vector<2x32xf32>
    %343 = arith.mulf %336, %297 : vector<2x32xf32>
    %344 = arith.mulf %335, %341 : vector<2x32xf32>
    %345 = arith.addf %343, %344 : vector<2x32xf32>
    %346 = math.tanh %345 : vector<2x32xf32>
    %347 = arith.mulf %342, %346 : vector<2x32xf32>
    %c0_139 = arith.constant 0 : index
    %c192 = arith.constant 192 : index
    %348 = vector.load %arg11[%c0_139, %c192] : memref<2x256xf32, #tpu.memory_space<vmem>>, vector<2x32xf32>
    tpu.vector_store %arg11[%c0_139, %c192], %347 {strides = array<i32>} : memref<2x256xf32, #tpu.memory_space<vmem>>, vector<2x32xf32>,
    %c0_140 = arith.constant 0 : index
    %c7 = arith.constant 7 : index
    %c0_141 = arith.constant 0 : index
    %349 = vector.load %arg10[%c0_140, %c7, %c0_141] : memref<2x8x128xf32, #tpu.memory_space<vmem>>, vector<2x1x128xf32>
    %350 = vector.shape_cast %349 : vector<2x1x128xf32> to vector<2x128xf32>
    %c0_142 = arith.constant 0 : index
    %c0_143 = arith.constant 0 : index
    %351 = vector.load %arg3[%c0_142, %c0_143] : memref<32x128xf32, #tpu.memory_space<vmem>>, vector<32x128xf32>
    %cst_144 = arith.constant dense<0.000000e+00> : vector<2x128xf32>
    %352 = tpu.matmul %323, %351, %cst_144 {dimension_numbers = #tpu.dot_dimension_numbers<[1], [0], [0], [1], [0, 0, 1, 1], [], []>} : vector<2x32xf32>, vector<32x128xf32>, vector<2x128xf32> -> vector<2x128xf32>
    %353 = arith.addf %350, %352 : vector<2x128xf32>
    %354 = arith.negf %353 : vector<2x128xf32>
    %355 = math.exp %354 : vector<2x128xf32>
    %cst_145 = arith.constant 1.000000e+00 : f32
    %356 = vector.broadcast %cst_145 : f32 to vector<2x128xf32>
    %357 = arith.addf %356, %355 : vector<2x128xf32>
    %358 = arith.divf %356, %357 : vector<2x128xf32>
    %359 = vector.extract_strided_slice %358 {offsets = [0, 0], sizes = [2, 32], strides = [1, 1]} : vector<2x128xf32> to vector<2x32xf32>
    %360 = vector.extract_strided_slice %358 {offsets = [0, 32], sizes = [2, 32], strides = [1, 1]} : vector<2x128xf32> to vector<2x32xf32>
    %361 = vector.extract_strided_slice %358 {offsets = [0, 64], sizes = [2, 32], strides = [1, 1]} : vector<2x128xf32> to vector<2x32xf32>
    %cst_146 = arith.constant 2.000000e+00 : f32
    %362 = vector.broadcast %cst_146 : f32 to vector<2x32xf32>
    %363 = arith.mulf %362, %361 : vector<2x32xf32>
    %cst_147 = arith.constant 1.000000e+00 : f32
    %364 = vector.broadcast %cst_147 : f32 to vector<2x32xf32>
    %365 = arith.subf %363, %364 : vector<2x32xf32>
    %366 = vector.extract_strided_slice %358 {offsets = [0, 96], sizes = [2, 32], strides = [1, 1]} : vector<2x128xf32> to vector<2x32xf32>
    %367 = arith.mulf %360, %321 : vector<2x32xf32>
    %368 = arith.mulf %359, %365 : vector<2x32xf32>
    %369 = arith.addf %367, %368 : vector<2x32xf32>
    %370 = math.tanh %369 : vector<2x32xf32>
    %371 = arith.mulf %366, %370 : vector<2x32xf32>
    %c0_148 = arith.constant 0 : index
    %c0_149 = arith.constant 0 : index
    %372 = vector.load %arg4[%c0_148, %c0_149] : memref<32x128xf32, #tpu.memory_space<vmem>>, vector<32x128xf32>
    %cst_150 = arith.constant dense<0.000000e+00> : vector<2x128xf32>
    %373 = tpu.matmul %371, %372, %cst_150 {dimension_numbers = #tpu.dot_dimension_numbers<[1], [0], [0], [1], [0, 0, 1, 1], [], []>} : vector<2x32xf32>, vector<32x128xf32>, vector<2x128xf32> -> vector<2x128xf32>
    %c0_151 = arith.constant 0 : index
    %c0_152 = arith.constant 0 : index
    %374 = vector.load %arg5[%c0_151, %c0_152] : memref<32x128xf32, #tpu.memory_space<vmem>>, vector<32x128xf32>
    %cst_153 = arith.constant dense<0.000000e+00> : vector<2x128xf32>
    %375 = tpu.matmul %347, %374, %cst_153 {dimension_numbers = #tpu.dot_dimension_numbers<[1], [0], [0], [1], [0, 0, 1, 1], [], []>} : vector<2x32xf32>, vector<32x128xf32>, vector<2x128xf32> -> vector<2x128xf32>
    %376 = arith.addf %373, %375 : vector<2x128xf32>
    %377 = arith.addf %376, %11 : vector<2x128xf32>
    %378 = arith.negf %377 : vector<2x128xf32>
    %379 = math.exp %378 : vector<2x128xf32>
    %cst_154 = arith.constant 1.000000e+00 : f32
    %380 = vector.broadcast %cst_154 : f32 to vector<2x128xf32>
    %381 = arith.addf %380, %379 : vector<2x128xf32>
    %382 = arith.divf %380, %381 : vector<2x128xf32>
    %383 = vector.extract_strided_slice %382 {offsets = [0, 0], sizes = [2, 32], strides = [1, 1]} : vector<2x128xf32> to vector<2x32xf32>
    %384 = vector.extract_strided_slice %382 {offsets = [0, 32], sizes = [2, 32], strides = [1, 1]} : vector<2x128xf32> to vector<2x32xf32>
    %385 = vector.extract_strided_slice %382 {offsets = [0, 64], sizes = [2, 32], strides = [1, 1]} : vector<2x128xf32> to vector<2x32xf32>
    %cst_155 = arith.constant 2.000000e+00 : f32
    %386 = vector.broadcast %cst_155 : f32 to vector<2x32xf32>
    %387 = arith.mulf %386, %385 : vector<2x32xf32>
    %cst_156 = arith.constant 1.000000e+00 : f32
    %388 = vector.broadcast %cst_156 : f32 to vector<2x32xf32>
    %389 = arith.subf %387, %388 : vector<2x32xf32>
    %390 = vector.extract_strided_slice %382 {offsets = [0, 96], sizes = [2, 32], strides = [1, 1]} : vector<2x128xf32> to vector<2x32xf32>
    %391 = arith.mulf %384, %345 : vector<2x32xf32>
    %392 = arith.mulf %383, %389 : vector<2x32xf32>
    %393 = arith.addf %391, %392 : vector<2x32xf32>
    %394 = math.tanh %393 : vector<2x32xf32>
    %395 = arith.mulf %390, %394 : vector<2x32xf32>
    %c0_157 = arith.constant 0 : index
    %c224 = arith.constant 224 : index
    %396 = vector.load %arg11[%c0_157, %c224] : memref<2x256xf32, #tpu.memory_space<vmem>>, vector<2x32xf32>
    tpu.vector_store %arg11[%c0_157, %c224], %395 {strides = array<i32>} : memref<2x256xf32, #tpu.memory_space<vmem>>, vector<2x32xf32>,
    %c0_158 = arith.constant 0 : index
    %c0_159 = arith.constant 0 : index
    %397 = vector.load %arg11[%c0_158, %c0_159] : memref<2x256xf32, #tpu.memory_space<vmem>>, vector<2x256xf32>
    %c0_160 = arith.constant 0 : index
    %c0_161 = arith.constant 0 : index
    %398 = vector.load %arg7[%c0_160, %c0_161] : memref<256x56xf32, #tpu.memory_space<vmem>>, vector<256x56xf32>
    %cst_162 = arith.constant dense<0.000000e+00> : vector<2x56xf32>
    %399 = tpu.matmul %397, %398, %cst_162 {dimension_numbers = #tpu.dot_dimension_numbers<[1], [0], [0], [1], [0, 0, 1, 1], [], []>} : vector<2x256xf32>, vector<256x56xf32>, vector<2x56xf32> -> vector<2x56xf32>
    %c0_163 = arith.constant 0 : index
    %c0_164 = arith.constant 0 : index
    %400 = vector.load %arg8[%c0_163, %c0_164] : memref<1x56xf32, #tpu.memory_space<vmem>>, vector<1x56xf32>
    %401 = vector.broadcast %400 : vector<1x56xf32> to vector<2x56xf32>
    %402 = arith.addf %399, %401 : vector<2x56xf32>
    %c0_165 = arith.constant 0 : index
    %c0_166 = arith.constant 0 : index
    %403 = vector.load %arg9[%c0_165, %c0_166] : memref<2x56xf32, #tpu.memory_space<vmem>>, vector<2x56xf32>
    tpu.vector_store %arg9[%c0_165, %c0_166], %402 {strides = array<i32>} : memref<2x56xf32, #tpu.memory_space<vmem>>, vector<2x56xf32>,
    return
  }
}

</mosaic_0001>

<bundles_post_ra>
// kernel: tpu_custom_call.1
= control target key start
LH: loop header
LB: loop body
LE: loop exit
PB: predicated region body
PF: predicated region fallthrough
CT: control target
= control target key end

     0   :  { %vm45_vm0 = vcmask 154624   ;;  %vm52_vm1 = vcmask 1042432   ;;  %v3768_v5 = vmov 0.0|0.0   ;;  %vm3769_vm2 = vmmov 0   ;;  %s4482_s0 = inlined_call_operand.vmem [shape: f32[2,8,19], index: 0, kind: input, shape index: {}]   ;;  %s4483_s1 = inlined_call_operand.vmem [shape: f32[19,128], index: 1, kind: input, shape index: {}]   ;;  %s4484_s2 = inlined_call_operand.vmem [shape: f32[1,128], index: 2, kind: input, shape index: {}]   ;;  %s4485_s3 = inlined_call_operand.vmem [shape: f32[32,128], index: 3, kind: input, shape index: {}]   ;;  %s4486_s4 = inlined_call_operand.vmem [shape: f32[32,128], index: 4, kind: input, shape index: {}]   ;;  %s4487_s5 = inlined_call_operand.vmem [shape: f32[32,128], index: 5, kind: input, shape index: {}]   ;;  %s4488_s6 = inlined_call_operand.vmem [shape: f32[1,128], index: 6, kind: input, shape index: {}]   ;;  %s4489_s7 = inlined_call_operand.vmem [shape: f32[256,56], index: 7, kind: input, shape index: {}]   ;;  %s4490_s8 = inlined_call_operand.vmem [shape: f32[1,56], index: 8, kind: input, shape index: {}]   ;;  %s4491_s9 = inlined_call_operand.hbm [shape: f32[2,56], index: 9, kind: output, shape index: {}]  }
   0x1   :  { %v35_v0 = vld [vmem:[%s4483_s1] sm:$0xff]  ;;  %v36_v1 = vld [vmem:[%s4483_s1 + $0x8] sm:$0xff]  ;;  %v37_v4 = vld [vmem:[%s4483_s1 + $0x10] sm:$0x7]  ;;  %3439 = vmatprep.subr.bf16.mxu1 %v3768_v5  ;;  %v3770_v8 = vmov 0.0  }
   0x2   :  { %v3411_v2 = vpack.c.bf16 %v36_v1, %v35_v0  ;;  %v33_v3 = vld [vmem:[%s4482_s0] sm:$0xff]  ;;  %v143_v7 = vld [vmem:[%s4485_s3 + $0x8] sm:$0xff]  ;;  %3199 = vmatprep.mubr.msk.f32.mxu1 %vm3769_vm2, %v3770_v8 }
   0x3   :  { %3144 = vmatprep.mubr.msk.f32.mxu0 %vm45_vm0, %v33_v3  ;;  %v142_v6 = vld [vmem:[%s4485_s3] sm:$0xff] }
   0x4   :  { %3412 = vmatprep.subr.bf16.mxu0 %v3411_v2 }
   0x5   :  { %14 = vsyncpa [#allocation5], 0  ;;  %3414 = vmatpush3.bf16.msra.mxu0 %v3411_v2  ;;  %v34_v9 = vld [vmem:[%s4482_s0 + $0x8] sm:$0xff]  ;;  %v3852_v10 = vpack.c.bf16 %v143_v7, %v142_v6  ;;  %v144_v11 = vld [vmem:[%s4485_s3 + $0x10] sm:$0xff]  ;;  %s3772_s27 = smov 32   ;;  %vm357_vm3 = vcmask 1041409  }
   0x6   :  { %3142 = vmatprep.subr.msk.mxu0 %vm52_vm1, %v37_v4  ;;  %v145_v12 = vld [vmem:[%s4485_s3 + $0x18] sm:$0xff]  ;;  %v2901_v14 = vld [vmem:[%s4484_s2] ss:$0 sm:$0xff]  ;;  %s3771_s2 = smov 64   ;;  %v281_v49 = vld [vmem:[%s4487_s5 + $0x8] sm:$0xff]  ;;  %vm146_vm4 = vcmask 261120  }
   0x7   :  { %v3864_v13 = vpack.c.bf16 %v145_v12, %v144_v11  ;;  %v280_v48 = vld [vmem:[%s4487_s5] sm:$0xff]  ;;  %v282_v50 = vld [vmem:[%s4487_s5 + $0x10] sm:$0xff]  ;;  %v283_v52 = vld [vmem:[%s4487_s5 + $0x18] sm:$0xff]  ;;  %vm470_vm5 = vcmask 254976   ;;  %vm801_vm6 = vcmask 517376   ;;  %s3774_s25 = smov 96  }
   0x8   :  { %v3896_v51 = vpack.c.bf16 %v281_v49, %v280_v48  ;;  %v3902_v53 = vpack.c.bf16 %v283_v52, %v282_v50  ;;  %v276_v54 = vld [vmem:[%s4486_s4] sm:$0xff]  ;;  %v277_v55 = vld [vmem:[%s4486_s4 + $0x8] sm:$0xff]  ;;  %v278_v58 = vld [vmem:[%s4486_s4 + $0x10] sm:$0xff]  ;;  %vm1132_vm7 = vcmask 779776   ;;  %vm1452_vm8 = vcmask 1042176   ;;  %s3775_s13 = smov [#allocation4]  }
   0x9   :  { %3143 = vmatpush3.msk.msra.mxu0 %vm52_vm1, %v37_v4  ;;  %v3915_v57 = vpack.c.bf16 %v277_v55, %v276_v54  ;;  %v279_v59 = vld [vmem:[%s4486_s4 + $0x18] sm:$0xff]  ;;  %vm2885_vm9 = vcmask 451584  }
   0xa   :  { %3145 = vmatmul.mubr.msk.f32.vlgmr.msra.gmra.mrb[0].mxu0 %vm45_vm0, %v34_v9  ;;  %3415 = vmatprep.subr.bf16.mxu0 %v3768_v5  ;;  %v3929_v61 = vpack.c.bf16 %v279_v59, %v278_v58  ;;  %v3955_v9 = vld [vmem:[%s4488_s6] ss:$0 sm:$0xff] }
   0xb   :  { %3417 = vmatpush3.bf16.msra.mxu0 %v3852_v10  ;;  %3155 = vmatprep.mubr.msk.f32.mxu0 %vm3769_vm2, %v3770_v8 }
   0xc   :  { %3418 = vmatprep.subr.bf16.mxu0 %v3768_v5  ;;  %3441 = vmatpush3.bf16.msra.mxu1 %v3896_v51 }
   0xd   :  { %3442 = vmatprep.subr.bf16.mxu1 %v3768_v5 }
   0xf   :  { %3420 = vmatpush3.bf16.msra.mxu0 %v3864_v13 }
  0x10   :  { %3421 = vmatprep.subr.bf16.mxu0 %v3768_v5  ;;  %3444 = vmatpush3.bf16.msra.mxu1 %v3902_v53 }
  0x11   :  { %3451 = vmatprep.subr.bf16.mxu1 %v3768_v5 }
  0x12   :  { %3156 = vmatmul.mubr.f32.vlgmr.msra.gmra.mrb[2].mxu0 %v3770_v8 }
  0x13   :  { %3166 = vmatprep.mubr.msk.f32.mxu0 %vm3769_vm2, %v3770_v8  ;;  %3423 = vmatpush3.bf16.msra.mxu0 %v3896_v51 }
  0x14   :  { %3424 = vmatprep.subr.bf16.mxu0 %v3768_v5 }
  0x17   :  { %3426 = vmatpush3.bf16.msra.mxu0 %v3902_v53 }
  0x18   :  { %3427 = vmatprep.subr.bf16.mxu0 %v3768_v5 }
  0x1a   :  { %3167 = vmatmul.mubr.f32.vlgmr.msra.gmra.mrb[4].mxu0 %v3770_v8 }
  0x1b   :  { %3429 = vmatpush3.bf16.msra.mxu0 %v3915_v57  ;;  %3177 = vmatprep.mubr.msk.f32.mxu0 %vm3769_vm2, %v3770_v8 }
  0x1c   :  { %3430 = vmatprep.subr.bf16.mxu0 %v3768_v5 }
  0x1f   :  { %3432 = vmatpush3.bf16.msra.mxu0 %v3929_v61 }
  0x20   :  { %3433 = vmatprep.subr.bf16.mxu0 %v3768_v5 }
  0xdd   :  { %v3146_v15 = vpop.f32.mrb[0].mxu0 }
  0xde   :  { %v128_v16 = vadd.f32 %v3146_v15, %v2901_v14  ;;  %v122_v17 = vpop.f32.mrb[1].mxu0 }
  0xdf   :  { %v123_v18 = vadd.f32 %v2901_v14, %v122_v17 }
  0xe0   :  { %132 = vst [vmem:[#allocation2 + $0x8] sm:$0xff] %v128_v16 }
  0xe1   :  { %131 = vst [vmem:[#allocation2] sm:$0xff] %v123_v18 }
  0xe5   :  { %v216_v19 = vpop.f32.mrb[2].mxu0 }
  0xe6   :  { %v221_v20 = vrot.slane %v216_v19, 1  ;;  %v3157_v21 = vpop.f32.mrb[3].mxu0 }
  0xe7   :  { %v141_v22 = vld [vmem:[#allocation2 + $0x8] sm:$0x1] }
  0xe8   :  { %v140_v23 = vld [vmem:[#allocation2] sm:$0x1]  ;;  %v225_v24 = vadd.f32 %v221_v20, %v141_v22  ;;  %v472_v17 = vld [vmem:[#allocation2 + $0x1] sm:$0x1]  ;;  %v473_v22 = vld [vmem:[#allocation2 + $0x9] sm:$0x1] }
  0xe9   :  { %v224_v25 = vadd.f32 %v216_v19, %v140_v23 }
  0xea   :  { %v2907_v26 = vmul.f32 -1.442695, %v225_v24 }
  0xeb   :  { %v2906_v27 = vmul.f32 -1.442695, %v224_v25 }
  0xec   :  { %3599 = vpow2.f32 %v2907_v26 }
  0xed   :  { %3601 = vpow2.f32 %v2906_v27  ;;  %v350_v4 = vpop.f32.mrb[4].mxu0 }
  0xee   :  { %v3168_v6 = vpop.f32.mrb[5].mxu0 }
  0xf6   :  { %v3600_v28 = vpop.eup %3599 }
  0xf7   :  { %v3602_v29 = vpop.eup %3601  ;;  %v233_v30 = vadd.f32 1.0, %v3600_v28 }
  0xf8   :  { %v232_v31 = vadd.f32 1.0, %v3602_v29 }
  0xf9   :  { %3603 = vrcp.f32 %v233_v30 }
  0xfa   :  { %3605 = vrcp.f32 %v232_v31 }
 0x103   :  { %v3604_v32 = vpop.eup %3603 }
 0x104   :  { %v3606_v33 = vpop.eup %3605  ;;  %v239_v34 = vmul.f32 2.0, %v3604_v32  ;;  %v243_v42 = vmul.f32 0.0, %v3604_v32 }
 0x105   :  { %v238_v36 = vmul.f32 2.0, %v3606_v33  ;;  %v242_v45 = vmul.f32 0.0, %v3606_v33 }
 0x106   :  { %v2909_v35 = vadd.f32 -1.0, %v239_v34 }
 0x107   :  { %v2908_v37 = vadd.f32 -1.0, %v238_v36 }
 0x108   :  { %248 = vrot.lane.b32.xlu0 %v2909_v35, %s3771_s2 }
 0x10c   :  { %246 = vrot.lane.b32.xlu0 %v2908_v37, %s3771_s2 }
 0x17a   :  { %v249_v38 = vpop.permute.xlu0 %248 }
 0x17b   :  { %v253_v39 = vmul.f32 %v3604_v32, %v249_v38 }
 0x17d   :  { %258 = vrot.lane.b32.xlu1 %v253_v39, %s3772_s27 }
 0x17e   :  { %v247_v40 = vpop.permute.xlu0 %246 }
 0x17f   :  { %v252_v41 = vmul.f32 %v3606_v33, %v247_v40 }
 0x181   :  { %256 = vrot.lane.b32.xlu1 %v252_v41, %s3772_s27 }
 0x1ef   :  { %v259_v43 = vpop.permute.xlu1 %258 }
 0x1f0   :  { %v3881_v44 = vadd.f32 %v259_v43, %v243_v42 }
 0x1f2   :  { %3607 = vtanh.f32 %v3881_v44 }
 0x1f3   :  { %v257_v46 = vpop.permute.xlu1 %256 }
 0x1f4   :  { %v3884_v47 = vadd.f32 %v257_v46, %v242_v45 }
 0x1f6   :  { %3609 = vtanh.f32 %v3884_v47 }
 0x1fc   :  { %v3608_v56 = vpop.eup %3607 }
 0x1fd   :  { %270 = vrot.lane.b32.xlu0 %v3608_v56, %s3771_s2 }
 0x200   :  { %v3610_v60 = vpop.eup %3609 }
 0x201   :  { %268 = vrot.lane.b32.xlu1 %v3610_v60, %s3771_s2 }
 0x26f   :  { %v271_v62 = vpop.permute.xlu0 %270 }
 0x270   :  { %v275_v63 = vmul.f32 %v3604_v32, %v271_v62 }
 0x272   :  { %v356_v1 = vrot.slane %v275_v63, 7 }
 0x273   :  { %v269_v0 = vpop.permute.xlu1 %268 }
 0x274   :  { %v274_v2 = vmul.f32 %v3606_v33, %v269_v0 }
 0x276   :  { %v358_v3 = vsel %vm357_vm3, %v356_v1, %v274_v2 }
 0x277   :  { %359 = vrot.lane.b32.xlu0 %v358_v3, %s3772_s27 }
 0x2e9   :  { %v360_v7 = vpop.permute.xlu0 %359 }
 0x2ea   :  { %3178 = vmatmul.mubr.msk.f32.vlgmr.msra.gmra.mrb[6].mxu0 %vm146_vm4, %v360_v7 }
 0x2eb   :  { %3435 = vmatpush3.bf16.msra.mxu0 %v3852_v10  ;;  %3188 = vmatprep.mubr.msk.f32.mxu0 %vm3769_vm2, %v3770_v8 }
 0x2ec   :  { %3436 = vmatprep.subr.bf16.mxu0 %v3768_v5 }
 0x2ef   :  { %3438 = vmatpush3.bf16.msra.mxu0 %v3864_v13 }
 0x2f0   :  { %3445 = vmatprep.subr.bf16.mxu0 %v3768_v5 }
 0x2f2   :  { %3189 = vmatmul.mubr.msk.f32.vlgmr.msra.gmra.mrb[8].mxu0 %vm146_vm4, %v360_v7 }
 0x2f3   :  { %3447 = vmatpush3.bf16.msra.mxu0 %v3915_v57  ;;  %3210 = vmatprep.mubr.msk.f32.mxu0 %vm3769_vm2, %v3770_v8 }
 0x2f4   :  { %3448 = vmatprep.subr.bf16.mxu0 %v3768_v5 }
 0x2f7   :  { %3450 = vmatpush3.bf16.msra.mxu0 %v3929_v61 }
 0x2f8   :  { %3457 = vmatprep.subr.bf16.mxu0 %v3768_v5 }
 0x3bd   :  { %v429_v11 = vpop.f32.mrb[6].mxu0 }
 0x3be   :  { %v430_v12 = vadd.f32 %v429_v11, %v350_v4  ;;  %v3179_v14 = vpop.f32.mrb[7].mxu0 }
 0x3c0   :  { %v433_v15 = vadd.f32 %v3955_v9, %v430_v12 }
 0x3c2   :  { %v2911_v16 = vmul.f32 -1.442695, %v433_v15 }
 0x3c4   :  { %3611 = vpow2.f32 %v2911_v16 }
 0x3c5   :  { %v544_v18 = vpop.f32.mrb[8].mxu0 }
 0x3c6   :  { %v549_v19 = vrot.slane %v544_v18, 1  ;;  %v552_v20 = vadd.f32 %v544_v18, %v472_v17  ;;  %v3190_v21 = vpop.f32.mrb[9].mxu0  ;;  %v803_v17 = vld [vmem:[#allocation2 + $0x2] sm:$0x1] }
 0x3c8   :  { %v553_v23 = vadd.f32 %v549_v19, %v473_v22  ;;  %v2914_v24 = vmul.f32 -1.442695, %v552_v20 }
 0x3ca   :  { %3613 = vpow2.f32 %v2914_v24  ;;  %v2915_v25 = vmul.f32 -1.442695, %v553_v23  ;;  %v804_v24 = vld [vmem:[#allocation2 + $0xa] sm:$0x1] }
 0x3cc   :  { %3615 = vpow2.f32 %v2915_v25 }
 0x3ce   :  { %v3612_v26 = vpop.eup %3611 }
 0x3cf   :  { %v437_v27 = vadd.f32 1.0, %v3612_v26 }
 0x3d1   :  { %3617 = vrcp.f32 %v437_v27 }
 0x3d4   :  { %v3614_v28 = vpop.eup %3613 }
 0x3d5   :  { %v560_v29 = vadd.f32 1.0, %v3614_v28 }
 0x3d6   :  { %v3616_v30 = vpop.eup %3615 }
 0x3d7   :  { %v561_v31 = vadd.f32 1.0, %v3616_v30  ;;  %3619 = vrcp.f32 %v560_v29 }
 0x3d9   :  { %3621 = vrcp.f32 %v561_v31 }
 0x3db   :  { %v3618_v32 = vpop.eup %3617 }
 0x3dc   :  { %v440_v33 = vmul.f32 2.0, %v3618_v32  ;;  %v442_v49 = vmul.f32 0.0, %v3618_v32 }
 0x3de   :  { %v2912_v34 = vadd.f32 -1.0, %v440_v33 }
 0x3e0   :  { %444 = vrot.lane.b32.xlu1 %v2912_v34, %s3771_s2 }
 0x3e1   :  { %v3620_v35 = vpop.eup %3619 }
 0x3e2   :  { %v566_v36 = vmul.f32 2.0, %v3620_v35  ;;  %v570_v54 = vmul.f32 %v3620_v35, %v3884_v47 }
 0x3e3   :  { %v3622_v37 = vpop.eup %3621 }
 0x3e4   :  { %v2916_v38 = vadd.f32 -1.0, %v566_v36  ;;  %v567_v39 = vmul.f32 2.0, %v3622_v37  ;;  %v571_v58 = vmul.f32 %v3622_v37, %v3881_v44 }
 0x3e6   :  { %574 = vrot.lane.b32.xlu1 %v2916_v38, %s3771_s2  ;;  %v2917_v40 = vadd.f32 -1.0, %v567_v39 }
 0x3e8   :  { %576 = vrot.lane.b32.xlu0 %v2917_v40, %s3771_s2 }
 0x452   :  { %v445_v41 = vpop.permute.xlu1 %444 }
 0x453   :  { %v447_v42 = vmul.f32 %v3618_v32, %v445_v41 }
 0x455   :  { %449 = vrot.lane.b32.xlu0 %v447_v42, %s3772_s27 }
 0x458   :  { %v575_v43 = vpop.permute.xlu1 %574 }
 0x459   :  { %v580_v45 = vmul.f32 %v3620_v35, %v575_v43 }
 0x45a   :  { %v577_v46 = vpop.permute.xlu0 %576 }
 0x45b   :  { %v581_v48 = vmul.f32 %v3622_v37, %v577_v46  ;;  %584 = vrot.lane.b32.xlu0 %v580_v45, %s3772_s27 }
 0x45d   :  { %586 = vrot.lane.b32.xlu1 %v581_v48, %s3772_s27 }
 0x4c7   :  { %v450_v50 = vpop.permute.xlu0 %449 }
 0x4c8   :  { %v3964_v52 = vadd.f32 %v450_v50, %v442_v49 }
 0x4ca   :  { %3623 = vtanh.f32 %v3964_v52 }
 0x4cd   :  { %v585_v55 = vpop.permute.xlu0 %584 }
 0x4ce   :  { %v3968_v56 = vadd.f32 %v585_v55, %v570_v54 }
 0x4cf   :  { %v587_v59 = vpop.permute.xlu1 %586 }
 0x4d0   :  { %3625 = vtanh.f32 %v3968_v56  ;;  %v3972_v60 = vadd.f32 %v587_v59, %v571_v58 }
 0x4d2   :  { %3627 = vtanh.f32 %v3972_v60 }
 0x4d4   :  { %v3624_v62 = vpop.eup %3623 }
 0x4d5   :  { %455 = vrot.lane.b32.xlu1 %v3624_v62, %s3771_s2 }
 0x4da   :  { %v3626_v63 = vpop.eup %3625 }
 0x4db   :  { %596 = vrot.lane.b32.xlu1 %v3626_v63, %s3771_s2 }
 0x4dc   :  { %v3628_v0 = vpop.eup %3627 }
 0x4dd   :  { %598 = vrot.lane.b32.xlu0 %v3628_v0, %s3771_s2 }
 0x547   :  { %v456_v47 = vpop.permute.xlu1 %455 }
 0x548   :  { %v3978_v1 = vmul.f32 %v3618_v32, %v456_v47 }
 0x54a   :  { %612 = vrot.lane.b32.xlu0 %v3978_v1, %s3772_s27 }
 0x54d   :  { %v597_v44 = vpop.permute.xlu1 %596 }
 0x54e   :  { %v602_v4 = vmul.f32 %v3620_v35, %v597_v44 }
 0x54f   :  { %v599_v2 = vpop.permute.xlu0 %598 }
 0x550   :  { %v603_v3 = vmul.f32 %v3622_v37, %v599_v2 }
 0x552   :  { %v688_v6 = vrot.slane %v603_v3, 7 }
 0x554   :  { %v689_v7 = vsel %vm357_vm3, %v688_v6, %v602_v4 }
 0x555   :  { %690 = vrot.lane.b32.xlu1 %v689_v7, %s3772_s27 }
 0x5bc   :  { %v613_v11 = vpop.permute.xlu0 %612 }
 0x5bd   :  { %3200 = vmatmul.mubr.msk.f32.vlgmr.msra.gmra.mrb[0].mxu1 %vm146_vm4, %v613_v11 }
 0x5be   :  { %3453 = vmatpush3.bf16.msra.mxu1 %v3852_v10  ;;  %3221 = vmatprep.mubr.msk.f32.mxu1 %vm3769_vm2, %v3770_v8 }
 0x5bf   :  { %3454 = vmatprep.subr.bf16.mxu1 %v3768_v5 }
 0x5c2   :  { %3456 = vmatpush3.bf16.msra.mxu1 %v3864_v13 }
 0x5c3   :  { %3463 = vmatprep.subr.bf16.mxu1 %v3768_v5 }
 0x5c7   :  { %v691_v12 = vpop.permute.xlu1 %690 }
 0x5c8   :  { %3211 = vmatmul.mubr.msk.f32.vlgmr.msra.gmra.mrb[10].mxu0 %vm146_vm4, %v691_v12  ;;  %3222 = vmatmul.mubr.msk.f32.vlgmr.msra.gmra.mrb[2].mxu1 %vm146_vm4, %v691_v12 }
 0x5c9   :  { %3459 = vmatpush3.bf16.msra.mxu0 %v3896_v51  ;;  %3465 = vmatpush3.bf16.msra.mxu1 %v3915_v57 }
 0x5ca   :  { %3460 = vmatprep.subr.bf16.mxu0 %v3768_v5  ;;  %3232 = vmatprep.mubr.msk.f32.mxu0 %vm3769_vm2, %v3770_v8 }
 0x5cb   :  { %3466 = vmatprep.subr.bf16.mxu1 %v3768_v5  ;;  %3243 = vmatprep.mubr.msk.f32.mxu1 %vm3769_vm2, %v3770_v8 }
 0x5cd   :  { %3462 = vmatpush3.bf16.msra.mxu0 %v3902_v53  ;;  %3468 = vmatpush3.bf16.msra.mxu1 %v3929_v61 }
 0x5ce   :  { %3469 = vmatprep.subr.bf16.mxu0 %v3768_v5  ;;  %3475 = vmatprep.subr.bf16.mxu1 %v3768_v5 }
 0x690   :  { %v682_v14 = vpop.f32.mrb[0].mxu1 }
 0x691   :  { %v3201_v15 = vpop.f32.mrb[1].mxu1 }
 0x69b   :  { %v760_v16 = vpop.f32.mrb[10].mxu0  ;;  %v875_v18 = vpop.f32.mrb[2].mxu1 }
 0x69c   :  { %v761_v19 = vadd.f32 %v760_v16, %v682_v14  ;;  %v880_v20 = vrot.slane %v875_v18, 1  ;;  %v883_v21 = vadd.f32 %v875_v18, %v803_v17  ;;  %v3212_v22 = vpop.f32.mrb[11].mxu0  ;;  %v3223_v23 = vpop.f32.mrb[3].mxu1 }
 0x69e   :  { %v764_v25 = vadd.f32 %v3955_v9, %v761_v19  ;;  %v884_v26 = vadd.f32 %v880_v20, %v804_v24  ;;  %v2923_v27 = vmul.f32 -1.442695, %v883_v21 }
 0x6a0   :  { %v2920_v28 = vmul.f32 -1.442695, %v764_v25  ;;  %3629 = vpow2.f32 %v2923_v27  ;;  %v2924_v29 = vmul.f32 -1.442695, %v884_v26  ;;  %v1134_v25 = vld [vmem:[#allocation2 + $0x3] sm:$0x1] }
 0x6a2   :  { %3631 = vpow2.f32 %v2920_v28 }
 0x6a3   :  { %3633 = vpow2.f32 %v2924_v29 }
 0x6aa   :  { %v3630_v30 = vpop.eup %3629 }
 0x6ab   :  { %v891_v31 = vadd.f32 1.0, %v3630_v30 }
 0x6ac   :  { %v3632_v32 = vpop.eup %3631 }
 0x6ad   :  { %v3634_v33 = vpop.eup %3633  ;;  %v768_v34 = vadd.f32 1.0, %v3632_v32  ;;  %3635 = vrcp.f32 %v891_v31  ;;  %v1135_v31 = vld [vmem:[#allocation2 + $0xb] sm:$0x1] }
 0x6ae   :  { %v892_v35 = vadd.f32 1.0, %v3634_v33 }
 0x6af   :  { %3637 = vrcp.f32 %v768_v34 }
 0x6b0   :  { %3639 = vrcp.f32 %v892_v35 }
 0x6b7   :  { %v3636_v36 = vpop.eup %3635 }
 0x6b8   :  { %v897_v42 = vmul.f32 2.0, %v3636_v36  ;;  %v901_v44 = vmul.f32 %v3636_v36, %v3968_v56 }
 0x6b9   :  { %v3638_v37 = vpop.eup %3637 }
 0x6ba   :  { %v3640_v38 = vpop.eup %3639  ;;  %v771_v39 = vmul.f32 2.0, %v3638_v37  ;;  %v2925_v45 = vadd.f32 -1.0, %v897_v42  ;;  %v773_v58 = vmul.f32 %v3638_v37, %v3964_v52 }
 0x6bb   :  { %v898_v40 = vmul.f32 2.0, %v3640_v38  ;;  %v902_v62 = vmul.f32 %v3640_v38, %v3972_v60 }
 0x6bc   :  { %v2921_v41 = vadd.f32 -1.0, %v771_v39 }
 0x6bd   :  { %v2926_v43 = vadd.f32 -1.0, %v898_v40 }
 0x6be   :  { %775 = vrot.lane.b32.xlu0 %v2921_v41, %s3771_s2 }
 0x6bf   :  { %907 = vrot.lane.b32.xlu1 %v2926_v43, %s3771_s2 }
 0x6c2   :  { %905 = vrot.lane.b32.xlu0 %v2925_v45, %s3771_s2 }
 0x730   :  { %v776_v46 = vpop.permute.xlu0 %775 }
 0x731   :  { %v908_v48 = vpop.permute.xlu1 %907  ;;  %v778_v49 = vmul.f32 %v3638_v37, %v776_v46 }
 0x732   :  { %v912_v50 = vmul.f32 %v3640_v38, %v908_v48 }
 0x733   :  { %780 = vrot.lane.b32.xlu1 %v778_v49, %s3772_s27 }
 0x734   :  { %917 = vrot.lane.b32.xlu0 %v912_v50, %s3772_s27  ;;  %v906_v54 = vpop.permute.xlu0 %905 }
 0x735   :  { %v911_v55 = vmul.f32 %v3636_v36, %v906_v54 }
 0x737   :  { %915 = vrot.lane.b32.xlu1 %v911_v55, %s3772_s27 }
 0x7a5   :  { %v781_v59 = vpop.permute.xlu1 %780 }
 0x7a6   :  { %v4014_v63 = vadd.f32 %v781_v59, %v773_v58  ;;  %v918_v0 = vpop.permute.xlu0 %917 }
 0x7a7   :  { %v4016_v47 = vadd.f32 %v918_v0, %v902_v62 }
 0x7a8   :  { %3641 = vtanh.f32 %v4014_v63 }
 0x7a9   :  { %3643 = vtanh.f32 %v4016_v47  ;;  %v916_v2 = vpop.permute.xlu1 %915 }
 0x7aa   :  { %v4021_v3 = vadd.f32 %v916_v2, %v901_v44 }
 0x7ac   :  { %3645 = vtanh.f32 %v4021_v3 }
 0x7b2   :  { %v3642_v52 = vpop.eup %3641 }
 0x7b3   :  { %v3644_v4 = vpop.eup %3643  ;;  %786 = vrot.lane.b32.xlu0 %v3642_v52, %s3771_s2 }
 0x7b4   :  { %929 = vrot.lane.b32.xlu1 %v3644_v4, %s3771_s2 }
 0x7b6   :  { %v3646_v60 = vpop.eup %3645 }
 0x7b7   :  { %927 = vrot.lane.b32.xlu0 %v3646_v60, %s3771_s2 }
 0x825   :  { %v787_v6 = vpop.permute.xlu0 %786 }
 0x826   :  { %v930_v7 = vpop.permute.xlu1 %929  ;;  %v4027_v11 = vmul.f32 %v3638_v37, %v787_v6 }
 0x827   :  { %v934_v56 = vmul.f32 %v3640_v38, %v930_v7 }
 0x828   :  { %943 = vrot.lane.b32.xlu1 %v4027_v11, %s3772_s27 }
 0x829   :  { %v928_v12 = vpop.permute.xlu0 %927  ;;  %v1019_v14 = vrot.slane %v934_v56, 7 }
 0x82a   :  { %v933_v15 = vmul.f32 %v3636_v36, %v928_v12 }
 0x82c   :  { %v1020_v16 = vsel %vm357_vm3, %v1019_v14, %v933_v15 }
 0x82d   :  { %1021 = vrot.lane.b32.xlu0 %v1020_v16, %s3772_s27 }
 0x89a   :  { %v944_v17 = vpop.permute.xlu1 %943 }
 0x89b   :  { %3233 = vmatmul.mubr.msk.f32.vlgmr.msra.gmra.mrb[12].mxu0 %vm146_vm4, %v944_v17 }
 0x89c   :  { %3471 = vmatpush3.bf16.msra.mxu0 %v3852_v10  ;;  %3254 = vmatprep.mubr.msk.f32.mxu0 %vm3769_vm2, %v3770_v8 }
 0x89d   :  { %3472 = vmatprep.subr.bf16.mxu0 %v3768_v5 }
 0x89f   :  { %v1022_v18 = vpop.permute.xlu0 %1021 }
 0x8a0   :  { %3474 = vmatpush3.bf16.msra.mxu0 %v3864_v13  ;;  %3244 = vmatmul.mubr.msk.f32.vlgmr.msra.gmra.mrb[4].mxu1 %vm146_vm4, %v1022_v18 }
 0x8a1   :  { %3477 = vmatpush3.bf16.msra.mxu1 %v3896_v51  ;;  %3481 = vmatprep.subr.bf16.mxu0 %v3768_v5 }
 0x8a2   :  { %3478 = vmatprep.subr.bf16.mxu1 %v3768_v5  ;;  %3265 = vmatprep.mubr.msk.f32.mxu1 %vm3769_vm2, %v3770_v8 }
 0x8a3   :  { %3255 = vmatmul.mubr.msk.f32.vlgmr.msra.gmra.mrb[14].mxu0 %vm146_vm4, %v1022_v18 }
 0x8a4   :  { %3483 = vmatpush3.bf16.msra.mxu0 %v3915_v57  ;;  %3276 = vmatprep.mubr.msk.f32.mxu0 %vm3769_vm2, %v3770_v8 }
 0x8a5   :  { %3480 = vmatpush3.bf16.msra.mxu1 %v3902_v53  ;;  %3484 = vmatprep.subr.bf16.mxu0 %v3768_v5 }
 0x8a6   :  { %3487 = vmatprep.subr.bf16.mxu1 %v3768_v5 }
 0x8a8   :  { %3486 = vmatpush3.bf16.msra.mxu0 %v3929_v61 }
 0x8a9   :  { %3493 = vmatprep.subr.bf16.mxu0 %v3768_v5 }
 0x96e   :  { %v1013_v19 = vpop.f32.mrb[12].mxu0 }
 0x96f   :  { %v3234_v20 = vpop.f32.mrb[13].mxu0 }
 0x973   :  { %v1091_v21 = vpop.f32.mrb[4].mxu1 }
 0x974   :  { %v1092_v22 = vadd.f32 %v1091_v21, %v1013_v19  ;;  %v3245_v23 = vpop.f32.mrb[5].mxu1 }
 0x976   :  { %v1095_v24 = vadd.f32 %v3955_v9, %v1092_v22  ;;  %v1206_v26 = vpop.f32.mrb[14].mxu0 }
 0x977   :  { %v1211_v27 = vrot.slane %v1206_v26, 1  ;;  %v1214_v28 = vadd.f32 %v1206_v26, %v1134_v25  ;;  %v3256_v29 = vpop.f32.mrb[15].mxu0 }
 0x978   :  { %v2929_v30 = vmul.f32 -1.442695, %v1095_v24 }
 0x979   :  { %v1215_v32 = vadd.f32 %v1211_v27, %v1135_v31  ;;  %v2932_v33 = vmul.f32 -1.442695, %v1214_v28  ;;  %v1454_v27 = vld [vmem:[#allocation2 + $0x4] sm:$0x1] }
 0x97a   :  { %3647 = vpow2.f32 %v2929_v30 }
 0x97b   :  { %3649 = vpow2.f32 %v2932_v33  ;;  %v2933_v34 = vmul.f32 -1.442695, %v1215_v32  ;;  %v1455_v32 = vld [vmem:[#allocation2 + $0xc] sm:$0x1] }
 0x97d   :  { %3651 = vpow2.f32 %v2933_v34 }
 0x984   :  { %v3648_v35 = vpop.eup %3647 }
 0x985   :  { %v3650_v36 = vpop.eup %3649  ;;  %v1099_v37 = vadd.f32 1.0, %v3648_v35 }
 0x986   :  { %v1222_v38 = vadd.f32 1.0, %v3650_v36 }
 0x987   :  { %v3652_v39 = vpop.eup %3651  ;;  %3653 = vrcp.f32 %v1099_v37 }
 0x988   :  { %v1223_v40 = vadd.f32 1.0, %v3652_v39  ;;  %3655 = vrcp.f32 %v1222_v38 }
 0x98a   :  { %3657 = vrcp.f32 %v1223_v40 }
 0x991   :  { %v3654_v41 = vpop.eup %3653 }
 0x992   :  { %v3656_v42 = vpop.eup %3655  ;;  %v1102_v43 = vmul.f32 2.0, %v3654_v41  ;;  %v1104_v2 = vmul.f32 %v3654_v41, %v4014_v63 }
 0x993   :  { %v1228_v48 = vmul.f32 2.0, %v3656_v42  ;;  %v1232_v7 = vmul.f32 %v3656_v42, %v4021_v3 }
 0x994   :  { %v3658_v45 = vpop.eup %3657  ;;  %v2930_v46 = vadd.f32 -1.0, %v1102_v43 }
 0x995   :  { %v1229_v49 = vmul.f32 2.0, %v3658_v45  ;;  %v2934_v54 = vadd.f32 -1.0, %v1228_v48  ;;  %v1233_v60 = vmul.f32 %v3658_v45, %v4016_v47 }
 0x996   :  { %1106 = vrot.lane.b32.xlu1 %v2930_v46, %s3771_s2 }
 0x997   :  { %v2935_v50 = vadd.f32 -1.0, %v1229_v49 }
 0x999   :  { %1238 = vrot.lane.b32.xlu0 %v2935_v50, %s3771_s2 }
 0x99a   :  { %1236 = vrot.lane.b32.xlu1 %v2934_v54, %s3771_s2 }
 0xa08   :  { %v1107_v55 = vpop.permute.xlu1 %1106 }
 0xa09   :  { %v1109_v58 = vmul.f32 %v3654_v41, %v1107_v55 }
 0xa0b   :  { %v1239_v59 = vpop.permute.xlu0 %1238  ;;  %1111 = vrot.lane.b32.xlu0 %v1109_v58, %s3772_s27 }
 0xa0c   :  { %v1243_v62 = vmul.f32 %v3658_v45, %v1239_v59  ;;  %v1237_v0 = vpop.permute.xlu1 %1236 }
 0xa0d   :  { %v1242_v44 = vmul.f32 %v3656_v42, %v1237_v0 }
 0xa0e   :  { %1248 = vrot.lane.b32.xlu1 %v1243_v62, %s3772_s27 }
 0xa0f   :  { %1246 = vrot.lane.b32.xlu0 %v1242_v44, %s3772_s27 }
 0xa7d   :  { %v1112_v52 = vpop.permute.xlu0 %1111 }
 0xa7e   :  { %v4062_v4 = vadd.f32 %v1112_v52, %v1104_v2 }
 0xa80   :  { %3659 = vtanh.f32 %v4062_v4  ;;  %v1249_v6 = vpop.permute.xlu1 %1248 }
 0xa81   :  { %v4067_v56 = vadd.f32 %v1249_v6, %v1233_v60  ;;  %v1247_v12 = vpop.permute.xlu0 %1246 }
 0xa82   :  { %v4069_v14 = vadd.f32 %v1247_v12, %v1232_v7 }
 0xa83   :  { %3661 = vtanh.f32 %v4067_v56 }
 0xa84   :  { %3663 = vtanh.f32 %v4069_v14 }
 0xa8a   :  { %v3660_v63 = vpop.eup %3659 }
 0xa8b   :  { %1117 = vrot.lane.b32.xlu1 %v3660_v63, %s3771_s2 }
 0xa8d   :  { %v3662_v15 = vpop.eup %3661 }
 0xa8e   :  { %v3664_v16 = vpop.eup %3663  ;;  %1260 = vrot.lane.b32.xlu0 %v3662_v15, %s3771_s2 }
 0xa8f   :  { %1258 = vrot.lane.b32.xlu1 %v3664_v16, %s3771_s2 }
 0xafd   :  { %v1118_v47 = vpop.permute.xlu1 %1117 }
 0xafe   :  { %v4076_v3 = vmul.f32 %v3654_v41, %v1118_v47 }
 0xb00   :  { %v1261_v17 = vpop.permute.xlu0 %1260  ;;  %1274 = vrot.lane.b32.xlu0 %v4076_v3, %s3772_s27 }
 0xb01   :  { %v1265_v18 = vmul.f32 %v3658_v45, %v1261_v17  ;;  %v1259_v19 = vpop.permute.xlu1 %1258 }
 0xb02   :  { %v1264_v20 = vmul.f32 %v3656_v42, %v1259_v19 }
 0xb03   :  { %v1350_v21 = vrot.slane %v1265_v18, 7 }
 0xb05   :  { %v1351_v22 = vsel %vm357_vm3, %v1350_v21, %v1264_v20 }
 0xb06   :  { %1352 = vrot.lane.b32.xlu1 %v1351_v22, %s3772_s27 }
 0xb72   :  { %v1275_v23 = vpop.permute.xlu0 %1274 }
 0xb73   :  { %3266 = vmatmul.mubr.msk.f32.vlgmr.msra.gmra.mrb[6].mxu1 %vm146_vm4, %v1275_v23 }
 0xb74   :  { %3489 = vmatpush3.bf16.msra.mxu1 %v3852_v10  ;;  %3287 = vmatprep.mubr.msk.f32.mxu1 %vm3769_vm2, %v3770_v8 }
 0xb75   :  { %3490 = vmatprep.subr.bf16.mxu1 %v3768_v5 }
 0xb78   :  { %v1353_v24 = vpop.permute.xlu1 %1352  ;;  %3492 = vmatpush3.bf16.msra.mxu1 %v3864_v13 }
 0xb79   :  { %3277 = vmatmul.mubr.msk.f32.vlgmr.msra.gmra.mrb[16].mxu0 %vm146_vm4, %v1353_v24  ;;  %3499 = vmatprep.subr.bf16.mxu1 %v3768_v5 }
 0xb7a   :  { %3495 = vmatpush3.bf16.msra.mxu0 %v3896_v51  ;;  %3298 = vmatprep.mubr.msk.f32.mxu0 %vm3769_vm2, %v3770_v8 }
 0xb7b   :  { %3288 = vmatmul.mubr.msk.f32.vlgmr.msra.gmra.mrb[8].mxu1 %vm146_vm4, %v1353_v24  ;;  %3496 = vmatprep.subr.bf16.mxu0 %v3768_v5  ;;  %v1787_v24 = vld [vmem:[%s4485_s3] sm:$0xff] }
 0xb7c   :  { %3501 = vmatpush3.bf16.msra.mxu1 %v3915_v57  ;;  %3309 = vmatprep.mubr.msk.f32.mxu1 %vm3769_vm2, %v3770_v8 }
 0xb7d   :  { %3502 = vmatprep.subr.bf16.mxu1 %v3768_v5 }
 0xb7e   :  { %3498 = vmatpush3.bf16.msra.mxu0 %v3902_v53 }
 0xb7f   :  { %3505 = vmatprep.subr.bf16.mxu0 %v3768_v5 }
 0xb80   :  { %3504 = vmatpush3.bf16.msra.mxu1 %v3929_v61 }
 0xb81   :  { %3511 = vmatprep.subr.bf16.mxu1 %v3768_v5 }
 0xc46   :  { %v1344_v10 = vpop.f32.mrb[6].mxu1 }
 0xc47   :  { %v3267_v13 = vpop.f32.mrb[7].mxu1 }
 0xc4c   :  { %v1422_v51 = vpop.f32.mrb[16].mxu0 }
 0xc4d   :  { %v1423_v25 = vadd.f32 %v1422_v51, %v1344_v10  ;;  %v3278_v26 = vpop.f32.mrb[17].mxu0  ;;  %v1788_v10 = vld [vmem:[%s4485_s3 + $0x8] sm:$0xff]  ;;  %v1789_v51 = vld [vmem:[%s4485_s3 + $0x10] sm:$0xff] }
 0xc4e   :  { %v1526_v57 = vpop.f32.mrb[8].mxu1  ;;  %v4137_v13 = vpack.c.bf16 %v1788_v10, %v1787_v24  ;;  %v1924_v10 = vld [vmem:[%s4487_s5 + $0x18] sm:$0xff] }
 0xc4f   :  { %v1426_v28 = vadd.f32 %v3955_v9, %v1423_v25  ;;  %v1531_v29 = vrot.slane %v1526_v57, 1  ;;  %v1534_v30 = vadd.f32 %v1526_v57, %v1454_v27  ;;  %v3289_v31 = vpop.f32.mrb[9].mxu1  ;;  %v1790_v25 = vld [vmem:[%s4485_s3 + $0x18] sm:$0xff] }
 0xc50   :  { %v4147_v27 = vpack.c.bf16 %v1790_v25, %v1789_v51  ;;  %v1917_v51 = vld [vmem:[%s4486_s4] sm:$0xff]  ;;  %v1918_v25 = vld [vmem:[%s4486_s4 + $0x8] sm:$0xff] }
 0xc51   :  { %v2938_v53 = vmul.f32 -1.442695, %v1426_v28  ;;  %v1535_v33 = vadd.f32 %v1531_v29, %v1455_v32  ;;  %v2941_v34 = vmul.f32 -1.442695, %v1534_v30 }
 0xc53   :  { %3665 = vpow2.f32 %v2938_v53  ;;  %v2942_v61 = vmul.f32 -1.442695, %v1535_v33  ;;  %v1785_v33 = vld [vmem:[#allocation2 + $0x5] sm:$0x1] }
 0xc54   :  { %3667 = vpow2.f32 %v2941_v34 }
 0xc55   :  { %3669 = vpow2.f32 %v2942_v61 }
 0xc5d   :  { %v3666_v35 = vpop.eup %3665 }
 0xc5e   :  { %v3668_v36 = vpop.eup %3667  ;;  %v1430_v37 = vadd.f32 1.0, %v3666_v35 }
 0xc5f   :  { %v3670_v38 = vpop.eup %3669  ;;  %v1542_v39 = vadd.f32 1.0, %v3668_v36 }
 0xc60   :  { %3671 = vrcp.f32 %v1430_v37  ;;  %v1543_v40 = vadd.f32 1.0, %v3670_v38  ;;  %v1786_v38 = vld [vmem:[#allocation2 + $0xd] sm:$0x1] }
 0xc61   :  { %3673 = vrcp.f32 %v1542_v39 }
 0xc62   :  { %3675 = vrcp.f32 %v1543_v40 }
 0xc6a   :  { %v3672_v41 = vpop.eup %3671 }
 0xc6b   :  { %v3674_v42 = vpop.eup %3673  ;;  %v1433_v43 = vmul.f32 2.0, %v3672_v41  ;;  %v1435_v2 = vmul.f32 %v3672_v41, %v4062_v4 }
 0xc6c   :  { %v3676_v45 = vpop.eup %3675  ;;  %v1548_v49 = vmul.f32 2.0, %v3674_v42  ;;  %v1552_v63 = vmul.f32 %v3674_v42, %v4069_v14 }
 0xc6d   :  { %v2939_v46 = vadd.f32 -1.0, %v1433_v43  ;;  %v1549_v48 = vmul.f32 2.0, %v3676_v45  ;;  %v1553_v6 = vmul.f32 %v3676_v45, %v4067_v56 }
 0xc6e   :  { %v2943_v54 = vadd.f32 -1.0, %v1548_v49 }
 0xc6f   :  { %1437 = vrot.lane.b32.xlu0 %v2939_v46, %s3771_s2  ;;  %v2944_v50 = vadd.f32 -1.0, %v1549_v48 }
 0xc71   :  { %1558 = vrot.lane.b32.xlu1 %v2944_v50, %s3771_s2 }
 0xc73   :  { %1556 = vrot.lane.b32.xlu0 %v2943_v54, %s3771_s2 }
 0xce1   :  { %v1438_v55 = vpop.permute.xlu0 %1437 }
 0xce2   :  { %v1440_v58 = vmul.f32 %v3672_v41, %v1438_v55 }
 0xce3   :  { %v1559_v59 = vpop.permute.xlu1 %1558 }
 0xce4   :  { %v1563_v62 = vmul.f32 %v3676_v45, %v1559_v59  ;;  %1442 = vrot.lane.b32.xlu1 %v1440_v58, %s3772_s27 }
 0xce5   :  { %v1557_v0 = vpop.permute.xlu0 %1556 }
 0xce6   :  { %v1562_v44 = vmul.f32 %v3674_v42, %v1557_v0  ;;  %1568 = vrot.lane.b32.xlu0 %v1563_v62, %s3772_s27 }
 0xce8   :  { %1566 = vrot.lane.b32.xlu1 %v1562_v44, %s3772_s27 }
 0xd56   :  { %v1443_v52 = vpop.permute.xlu1 %1442 }
 0xd57   :  { %v4111_v60 = vadd.f32 %v1443_v52, %v1435_v2 }
 0xd58   :  { %v1569_v7 = vpop.permute.xlu0 %1568 }
 0xd59   :  { %3677 = vtanh.f32 %v4111_v60  ;;  %v4115_v12 = vadd.f32 %v1569_v7, %v1553_v6 }
 0xd5a   :  { %v1567_v15 = vpop.permute.xlu1 %1566 }
 0xd5b   :  { %3679 = vtanh.f32 %v4115_v12  ;;  %v4119_v16 = vadd.f32 %v1567_v15, %v1552_v63 }
 0xd5d   :  { %3681 = vtanh.f32 %v4119_v16 }
 0xd63   :  { %v3678_v4 = vpop.eup %3677 }
 0xd64   :  { %1448 = vrot.lane.b32.xlu0 %v3678_v4, %s3771_s2 }
 0xd65   :  { %v3680_v47 = vpop.eup %3679 }
 0xd66   :  { %1580 = vrot.lane.b32.xlu1 %v3680_v47, %s3771_s2 }
 0xd67   :  { %v3682_v56 = vpop.eup %3681 }
 0xd68   :  { %1578 = vrot.lane.b32.xlu0 %v3682_v56, %s3771_s2 }
 0xdd6   :  { %v1449_v17 = vpop.permute.xlu0 %1448 }
 0xdd7   :  { %v4125_v18 = vmul.f32 %v3672_v41, %v1449_v17 }
 0xdd8   :  { %v1581_v14 = vpop.permute.xlu1 %1580 }
 0xdd9   :  { %v1585_v19 = vmul.f32 %v3676_v45, %v1581_v14  ;;  %1595 = vrot.lane.b32.xlu1 %v4125_v18, %s3772_s27 }
 0xdda   :  { %v1579_v20 = vpop.permute.xlu0 %1578 }
 0xddb   :  { %v1671_v21 = vrot.slane %v1585_v19, 7  ;;  %v1584_v22 = vmul.f32 %v3674_v42, %v1579_v20 }
 0xddd   :  { %v1672_v23 = vsel %vm357_vm3, %v1671_v21, %v1584_v22 }
 0xdde   :  { %1673 = vrot.lane.b32.xlu0 %v1672_v23, %s3772_s27 }
 0xe4b   :  { %v1596_v26 = vpop.permute.xlu1 %1595 }
 0xe4c   :  { %3299 = vmatmul.mubr.msk.f32.vlgmr.msra.gmra.mrb[18].mxu0 %vm146_vm4, %v1596_v26  ;;  %v4204_v26 = vpack.c.bf16 %v1918_v25, %v1917_v51 }
 0xe4d   :  { %3507 = vmatpush3.bf16.msra.mxu0 %v4137_v13  ;;  %3320 = vmatprep.mubr.msk.f32.mxu0 %vm3769_vm2, %v3770_v8 }
 0xe4e   :  { %3508 = vmatprep.subr.bf16.mxu0 %v3768_v5 }
 0xe50   :  { %v1674_v57 = vpop.permute.xlu0 %1673 }
 0xe51   :  { %3510 = vmatpush3.bf16.msra.mxu0 %v4147_v27  ;;  %3310 = vmatmul.mubr.msk.f32.vlgmr.msra.gmra.mrb[10].mxu1 %vm146_vm4, %v1674_v57 }
 0xe52   :  { %3517 = vmatprep.subr.bf16.mxu0 %v3768_v5  ;;  %3331 = vmatprep.mubr.msk.f32.mxu1 %vm3769_vm2, %v3770_v8 }
 0xe54   :  { %3321 = vmatmul.mubr.msk.f32.vlgmr.msra.gmra.mrb[20].mxu0 %vm146_vm4, %v1674_v57 }
 0xe55   :  { %3342 = vmatprep.mubr.msk.f32.mxu0 %vm3769_vm2, %v3770_v8  ;;  %3519 = vmatpush3.bf16.msra.mxu0 %v4204_v26 }
 0xe56   :  { %3520 = vmatprep.subr.bf16.mxu0 %v3768_v5 }
 0xf1f   :  { %v1665_v28 = vpop.f32.mrb[18].mxu0 }
 0xf20   :  { %v3300_v29 = vpop.f32.mrb[19].mxu0 }
 0xf24   :  { %v1743_v30 = vpop.f32.mrb[10].mxu1 }
 0xf25   :  { %v1744_v31 = vadd.f32 %v1743_v30, %v1665_v28  ;;  %v3311_v32 = vpop.f32.mrb[11].mxu1 }
 0xf26   :  { %v1920_v32 = vld [vmem:[%s4486_s4 + $0x18] sm:$0xff] }
 0xf27   :  { %v1747_v53 = vadd.f32 %v3955_v9, %v1744_v31  ;;  %v1857_v34 = vpop.f32.mrb[20].mxu0  ;;  %v1919_v31 = vld [vmem:[%s4486_s4 + $0x10] sm:$0xff] }
 0xf28   :  { %v1862_v61 = vrot.slane %v1857_v34, 1  ;;  %v1865_v35 = vadd.f32 %v1857_v34, %v1785_v33  ;;  %v3322_v36 = vpop.f32.mrb[21].mxu0 }
 0xf29   :  { %v2947_v37 = vmul.f32 -1.442695, %v1747_v53  ;;  %v4223_v53 = vpack.c.bf16 %v1920_v32, %v1919_v31 }
 0xf2a   :  { %v1866_v39 = vadd.f32 %v1862_v61, %v1786_v38  ;;  %v2950_v40 = vmul.f32 -1.442695, %v1865_v35 }
 0xf2b   :  { %3683 = vpow2.f32 %v2947_v37  ;;  %3522 = vmatpush3.bf16.msra.mxu0 %v4223_v53 }
 0xf2c   :  { %3685 = vpow2.f32 %v2950_v40  ;;  %v2951_v41 = vmul.f32 -1.442695, %v1866_v39  ;;  %3529 = vmatprep.subr.bf16.mxu0 %v3768_v5 }
 0xf2e   :  { %3687 = vpow2.f32 %v2951_v41 }
 0xf35   :  { %v3684_v42 = vpop.eup %3683 }
 0xf36   :  { %v3686_v43 = vpop.eup %3685  ;;  %v1751_v45 = vadd.f32 1.0, %v3684_v42 }
 0xf37   :  { %v1873_v46 = vadd.f32 1.0, %v3686_v43 }
 0xf38   :  { %v3688_v48 = vpop.eup %3687  ;;  %3689 = vrcp.f32 %v1751_v45 }
 0xf39   :  { %v1874_v49 = vadd.f32 1.0, %v3688_v48  ;;  %3691 = vrcp.f32 %v1873_v46 }
 0xf3b   :  { %3693 = vrcp.f32 %v1874_v49  ;;  %v2115_v49 = vld [vmem:[#allocation2 + $0x6] sm:$0x1] }
 0xf42   :  { %v3690_v50 = vpop.eup %3689 }
 0xf43   :  { %v4161_v54 = vpop.eup %3691  ;;  %v1754_v55 = vmul.f32 2.0, %v3690_v50  ;;  %v1756_v47 = vmul.f32 %v3690_v50, %v4111_v60  ;;  %v1921_v60 = vld [vmem:[%s4487_s5] sm:$0xff] }
 0xf44   :  { %v1879_v62 = vmul.f32 2.0, %v4161_v54  ;;  %v1883_v20 = vmul.f32 %v4161_v54, %v4119_v16  ;;  %v1923_v16 = vld [vmem:[%s4487_s5 + $0x10] sm:$0xff] }
 0xf45   :  { %v3694_v58 = vpop.eup %3693  ;;  %v2948_v59 = vadd.f32 -1.0, %v1754_v55  ;;  %v4207_v57 = vpack.c.bf16 %v1924_v10, %v1923_v16 }
 0xf46   :  { %v1880_v0 = vmul.f32 2.0, %v3694_v58  ;;  %v2952_v2 = vadd.f32 -1.0, %v1879_v62  ;;  %v1884_v14 = vmul.f32 %v3694_v58, %v4115_v12  ;;  %v1922_v12 = vld [vmem:[%s4487_s5 + $0x8] sm:$0xff] }
 0xf47   :  { %1758 = vrot.lane.b32.xlu1 %v2948_v59, %s3771_s2  ;;  %v4193_v24 = vpack.c.bf16 %v1922_v12, %v1921_v60  ;;  %v2116_v62 = vld [vmem:[#allocation2 + $0xe] sm:$0x1] }
 0xf48   :  { %v2953_v44 = vadd.f32 -1.0, %v1880_v0 }
 0xf49   :  { %3513 = vmatpush3.bf16.msra.mxu1 %v4193_v24 }
 0xf4a   :  { %1889 = vrot.lane.b32.xlu0 %v2953_v44, %s3771_s2  ;;  %3514 = vmatprep.subr.bf16.mxu1 %v3768_v5 }
 0xf4b   :  { %1887 = vrot.lane.b32.xlu1 %v2952_v2, %s3771_s2 }
 0xf4d   :  { %3516 = vmatpush3.bf16.msra.mxu1 %v4207_v57 }
 0xf4e   :  { %3523 = vmatprep.subr.bf16.mxu1 %v3768_v5 }
 0xfb9   :  { %v1759_v52 = vpop.permute.xlu1 %1758 }
 0xfba   :  { %v1761_v6 = vmul.f32 %v3690_v50, %v1759_v52 }
 0xfbc   :  { %v1890_v7 = vpop.permute.xlu0 %1889  ;;  %1763 = vrot.lane.b32.xlu0 %v1761_v6, %s3772_s27 }
 0xfbd   :  { %v1894_v63 = vmul.f32 %v3694_v58, %v1890_v7  ;;  %v1888_v15 = vpop.permute.xlu1 %1887 }
 0xfbe   :  { %v1893_v4 = vmul.f32 %v4161_v54, %v1888_v15 }
 0xfbf   :  { %1899 = vrot.lane.b32.xlu1 %v1894_v63, %s3772_s27 }
 0xfc0   :  { %1897 = vrot.lane.b32.xlu0 %v1893_v4, %s3772_s27 }
0x102e   :  { %v1764_v56 = vpop.permute.xlu0 %1763 }
0x102f   :  { %v4172_v17 = vadd.f32 %v1764_v56, %v1756_v47 }
0x1031   :  { %3695 = vtanh.f32 %v4172_v17  ;;  %v1900_v19 = vpop.permute.xlu1 %1899 }
0x1032   :  { %v4178_v21 = vadd.f32 %v1900_v19, %v1884_v14  ;;  %v1898_v22 = vpop.permute.xlu0 %1897 }
0x1033   :  { %v4180_v23 = vadd.f32 %v1898_v22, %v1883_v20 }
0x1034   :  { %3697 = vtanh.f32 %v4178_v21 }
0x1035   :  { %3699 = vtanh.f32 %v4180_v23 }
0x103b   :  { %v3696_v28 = vpop.eup %3695 }
0x103c   :  { %1769 = vrot.lane.b32.xlu1 %v3696_v28, %s3771_s2 }
0x103e   :  { %v3698_v29 = vpop.eup %3697 }
0x103f   :  { %v3700_v30 = vpop.eup %3699  ;;  %1911 = vrot.lane.b32.xlu0 %v3698_v29, %s3771_s2 }
0x1040   :  { %1909 = vrot.lane.b32.xlu1 %v3700_v30, %s3771_s2 }
0x10ae   :  { %v1770_v33 = vpop.permute.xlu1 %1769 }
0x10af   :  { %v4227_v34 = vmul.f32 %v3690_v50, %v1770_v33 }
0x10b1   :  { %v1912_v61 = vpop.permute.xlu0 %1911  ;;  %1925 = vrot.lane.b32.xlu0 %v4227_v34, %s3772_s27 }
0x10b2   :  { %v1916_v35 = vmul.f32 %v3694_v58, %v1912_v61  ;;  %v1910_v36 = vpop.permute.xlu1 %1909 }
0x10b3   :  { %v1915_v37 = vmul.f32 %v4161_v54, %v1910_v36 }
0x10b4   :  { %v2001_v38 = vrot.slane %v1916_v35, 7 }
0x10b6   :  { %v2002_v39 = vsel %vm357_vm3, %v2001_v38, %v1915_v37 }
0x10b7   :  { %2003 = vrot.lane.b32.xlu1 %v2002_v39, %s3772_s27 }
0x1123   :  { %v1926_v40 = vpop.permute.xlu0 %1925 }
0x1124   :  { %3332 = vmatmul.mubr.msk.f32.vlgmr.msra.gmra.mrb[12].mxu1 %vm146_vm4, %v1926_v40 }
0x1125   :  { %3525 = vmatpush3.bf16.msra.mxu1 %v4137_v13  ;;  %3353 = vmatprep.mubr.msk.f32.mxu1 %vm3769_vm2, %v3770_v8 }
0x1126   :  { %3526 = vmatprep.subr.bf16.mxu1 %v3768_v5 }
0x1129   :  { %v2004_v41 = vpop.permute.xlu1 %2003  ;;  %3528 = vmatpush3.bf16.msra.mxu1 %v4147_v27 }
0x112a   :  { %3343 = vmatmul.mubr.msk.f32.vlgmr.msra.gmra.mrb[22].mxu0 %vm146_vm4, %v2004_v41  ;;  %3535 = vmatprep.subr.bf16.mxu1 %v3768_v5 }
0x112b   :  { %3531 = vmatpush3.bf16.msra.mxu0 %v4193_v24  ;;  %3364 = vmatprep.mubr.msk.f32.mxu0 %vm3769_vm2, %v3770_v8 }
0x112c   :  { %3354 = vmatmul.mubr.msk.f32.vlgmr.msra.gmra.mrb[14].mxu1 %vm146_vm4, %v2004_v41  ;;  %3532 = vmatprep.subr.bf16.mxu0 %v3768_v5 }
0x112d   :  { %3537 = vmatpush3.bf16.msra.mxu1 %v4204_v26  ;;  %3375 = vmatprep.mubr.msk.f32.mxu1 %vm3769_vm2, %v3770_v8 }
0x112e   :  { %3538 = vmatprep.subr.bf16.mxu1 %v3768_v5 }
0x112f   :  { %3534 = vmatpush3.bf16.msra.mxu0 %v4207_v57 }
0x1130   :  { %3541 = vmatprep.subr.bf16.mxu0 %v3768_v5 }
0x1131   :  { %3540 = vmatpush3.bf16.msra.mxu1 %v4223_v53 }
0x1132   :  { %3547 = vmatprep.subr.bf16.mxu1 %v3768_v5 }
0x11f7   :  { %v1995_v42 = vpop.f32.mrb[12].mxu1 }
0x11f8   :  { %v3333_v43 = vpop.f32.mrb[13].mxu1 }
0x11fd   :  { %v2073_v45 = vpop.f32.mrb[22].mxu0 }
0x11fe   :  { %v2074_v46 = vadd.f32 %v2073_v45, %v1995_v42  ;;  %v3344_v48 = vpop.f32.mrb[23].mxu0 }
0x11ff   :  { %v2187_v50 = vpop.f32.mrb[14].mxu1 }
0x1200   :  { %v2077_v54 = vadd.f32 %v3955_v9, %v2074_v46  ;;  %v2192_v55 = vrot.slane %v2187_v50, 1  ;;  %v2195_v58 = vadd.f32 %v2187_v50, %v2115_v49  ;;  %v3355_v59 = vpop.f32.mrb[15].mxu1 }
0x1201   :  { %v4305_v59 = vld [vmem:[%s4488_s6] ss:$0 sm:$0xff] }
0x1202   :  { %v2956_v0 = vmul.f32 -1.442695, %v2077_v54  ;;  %v2196_v44 = vadd.f32 %v2192_v55, %v2116_v62  ;;  %v2959_v2 = vmul.f32 -1.442695, %v2195_v58  ;;  %v2445_v62 = vld [vmem:[#allocation2 + $0x7] sm:$0x1] }
0x1204   :  { %3701 = vpow2.f32 %v2956_v0  ;;  %v2960_v52 = vmul.f32 -1.442695, %v2196_v44 }
0x1205   :  { %3703 = vpow2.f32 %v2959_v2  ;;  %v2446_v2 = vld [vmem:[#allocation2 + $0xf] sm:$0x1] }
0x1206   :  { %3705 = vpow2.f32 %v2960_v52 }
0x120e   :  { %v3702_v6 = vpop.eup %3701 }
0x120f   :  { %v3704_v7 = vpop.eup %3703  ;;  %v2081_v63 = vadd.f32 1.0, %v3702_v6 }
0x1210   :  { %v3706_v15 = vpop.eup %3705  ;;  %v2203_v4 = vadd.f32 1.0, %v3704_v7 }
0x1211   :  { %3707 = vrcp.f32 %v2081_v63  ;;  %v2204_v47 = vadd.f32 1.0, %v3706_v15 }
0x1212   :  { %3709 = vrcp.f32 %v2203_v4 }
0x1213   :  { %3711 = vrcp.f32 %v2204_v47 }
0x121b   :  { %v3708_v9 = vpop.eup %3707 }
0x121c   :  { %v3710_v56 = vpop.eup %3709  ;;  %v2084_v14 = vmul.f32 2.0, %v3708_v9  ;;  %v2086_v31 = vmul.f32 %v3708_v9, %v4172_v17 }
0x121d   :  { %v3712_v19 = vpop.eup %3711  ;;  %v2209_v60 = vmul.f32 2.0, %v3710_v56  ;;  %v2213_v37 = vmul.f32 %v3710_v56, %v4180_v23 }
0x121e   :  { %v2957_v20 = vadd.f32 -1.0, %v2084_v14  ;;  %v2210_v22 = vmul.f32 2.0, %v3712_v19  ;;  %v2214_v61 = vmul.f32 %v3712_v19, %v4178_v21 }
0x121f   :  { %v2961_v16 = vadd.f32 -1.0, %v2209_v60 }
0x1220   :  { %2088 = vrot.lane.b32.xlu0 %v2957_v20, %s3771_s2  ;;  %v2962_v12 = vadd.f32 -1.0, %v2210_v22 }
0x1222   :  { %2219 = vrot.lane.b32.xlu1 %v2962_v12, %s3771_s2 }
0x1224   :  { %2217 = vrot.lane.b32.xlu0 %v2961_v16, %s3771_s2 }
0x1292   :  { %v2089_v10 = vpop.permute.xlu0 %2088 }
0x1293   :  { %v2091_v51 = vmul.f32 %v3708_v9, %v2089_v10 }
0x1294   :  { %v2220_v25 = vpop.permute.xlu1 %2219 }
0x1295   :  { %v2224_v28 = vmul.f32 %v3712_v19, %v2220_v25  ;;  %2093 = vrot.lane.b32.xlu1 %v2091_v51, %s3772_s27 }
0x1296   :  { %v2218_v29 = vpop.permute.xlu0 %2217 }
0x1297   :  { %v2223_v30 = vmul.f32 %v3710_v56, %v2218_v29  ;;  %2229 = vrot.lane.b32.xlu0 %v2224_v28, %s3772_s27 }
0x1299   :  { %2227 = vrot.lane.b32.xlu1 %v2223_v30, %s3772_s27 }
0x1307   :  { %v2094_v32 = vpop.permute.xlu1 %2093 }
0x1308   :  { %v4263_v33 = vadd.f32 %v2094_v32, %v2086_v31 }
0x1309   :  { %v2230_v35 = vpop.permute.xlu0 %2229 }
0x130a   :  { %3713 = vtanh.f32 %v4263_v33  ;;  %v4267_v36 = vadd.f32 %v2230_v35, %v2214_v61 }
0x130b   :  { %v2228_v38 = vpop.permute.xlu1 %2227 }
0x130c   :  { %3715 = vtanh.f32 %v4267_v36  ;;  %v4271_v39 = vadd.f32 %v2228_v38, %v2213_v37 }
0x130e   :  { %3717 = vtanh.f32 %v4271_v39 }
0x1314   :  { %v3714_v17 = vpop.eup %3713 }
0x1315   :  { %2099 = vrot.lane.b32.xlu0 %v3714_v17, %s3771_s2 }
0x1316   :  { %v3716_v40 = vpop.eup %3715 }
0x1317   :  { %2241 = vrot.lane.b32.xlu1 %v3716_v40, %s3771_s2 }
0x1318   :  { %v3718_v21 = vpop.eup %3717 }
0x1319   :  { %2239 = vrot.lane.b32.xlu0 %v3718_v21, %s3771_s2 }
0x1387   :  { %v2100_v41 = vpop.permute.xlu0 %2099 }
0x1388   :  { %v4277_v42 = vmul.f32 %v3708_v9, %v2100_v41 }
0x1389   :  { %v2242_v23 = vpop.permute.xlu1 %2241 }
0x138a   :  { %v2246_v43 = vmul.f32 %v3712_v19, %v2242_v23  ;;  %2255 = vrot.lane.b32.xlu1 %v4277_v42, %s3772_s27 }
0x138b   :  { %v2240_v45 = vpop.permute.xlu0 %2239 }
0x138c   :  { %v2331_v46 = vrot.slane %v2246_v43, 7  ;;  %v2245_v48 = vmul.f32 %v3710_v56, %v2240_v45 }
0x138e   :  { %v2332_v49 = vsel %vm357_vm3, %v2331_v46, %v2245_v48 }
0x138f   :  { %2333 = vrot.lane.b32.xlu0 %v2332_v49, %s3772_s27 }
0x13fc   :  { %v2256_v50 = vpop.permute.xlu1 %2255 }
0x13fd   :  { %3365 = vmatmul.mubr.msk.f32.vlgmr.msra.gmra.mrb[24].mxu0 %vm146_vm4, %v2256_v50 }
0x13fe   :  { %3543 = vmatpush3.bf16.msra.mxu0 %v4137_v13  ;;  %3386 = vmatprep.mubr.msk.f32.mxu0 %vm3769_vm2, %v3770_v8 }
0x13ff   :  { %3544 = vmatprep.subr.bf16.mxu0 %v3768_v5 }
0x1401   :  { %v2334_v54 = vpop.permute.xlu0 %2333 }
0x1402   :  { %3546 = vmatpush3.bf16.msra.mxu0 %v4147_v27  ;;  %3376 = vmatmul.mubr.msk.f32.vlgmr.msra.gmra.mrb[16].mxu1 %vm146_vm4, %v2334_v54 }
0x1403   :  { %3553 = vmatprep.subr.bf16.mxu0 %v3768_v5  ;;  %3549 = vmatpush3.bf16.msra.mxu1 %v4193_v24 }
0x1404   :  { %3550 = vmatprep.subr.bf16.mxu1 %v3768_v5  ;;  %3397 = vmatprep.mubr.msk.f32.mxu1 %vm3769_vm2, %v3770_v8 }
0x1405   :  { %3387 = vmatmul.mubr.msk.f32.vlgmr.msra.gmra.mrb[26].mxu0 %vm146_vm4, %v2334_v54 }
0x1406   :  { %3555 = vmatpush3.bf16.msra.mxu0 %v4204_v26  ;;  %3408 = vmatprep.mubr.msk.f32.mxu0 %vm3769_vm2, %v3770_v8 }
0x1407   :  { %3556 = vmatprep.subr.bf16.mxu0 %v3768_v5  ;;  %3552 = vmatpush3.bf16.msra.mxu1 %v4207_v57 }
0x140a   :  { %3558 = vmatpush3.bf16.msra.mxu0 %v4223_v53 }
0x14d0   :  { %v2325_v13 = vpop.f32.mrb[24].mxu0 }
0x14d1   :  { %v3366_v27 = vpop.f32.mrb[25].mxu0 }
0x14d5   :  { %v2403_v24 = vpop.f32.mrb[16].mxu1 }
0x14d6   :  { %v2404_v55 = vadd.f32 %v2403_v24, %v2325_v13  ;;  %v3377_v58 = vpop.f32.mrb[17].mxu1 }
0x14d8   :  { %v2407_v26 = vadd.f32 %v4305_v59, %v2404_v55  ;;  %v2517_v8 = vpop.f32.mrb[26].mxu0 }
0x14d9   :  { %v2522_v0 = vrot.slane %v2517_v8, 1  ;;  %v2525_v5 = vadd.f32 %v2517_v8, %v2445_v62  ;;  %v3388_v44 = vpop.f32.mrb[27].mxu0 }
0x14da   :  { %v2965_v57 = vmul.f32 -1.442695, %v2407_v26 }
0x14db   :  { %v2526_v53 = vadd.f32 %v2522_v0, %v2446_v2  ;;  %v2968_v52 = vmul.f32 -1.442695, %v2525_v5 }
0x14dc   :  { %3719 = vpow2.f32 %v2965_v57  ;;  %v3773_v57 = vmov 1983009808  }
0x14dd   :  { %3721 = vpow2.f32 %v2968_v52  ;;  %v2969_v6 = vmul.f32 -1.442695, %v2526_v53  ;;  %v461_v2 = vunpack.c.l.s4 %v3773_v57  ;;  %v463_v53 = vlaneseq  ;;  %v2778_v57 = vld [vmem:[%s4489_s7 + $0x68] sm:$0xff] }
0x14df   :  { %3723 = vpow2.f32 %v2969_v6  ;;  %v462_v52 = vunpack.c.0.s8 %v461_v2  ;;  %v464_v6 = vshrl.u32 %v463_v53, 7  ;;  %v2795_v2 = vld [vmem:[%s4489_s7 + $0xf0] sm:$0xff]  ;;  %v2796_v53 = vld [vmem:[%s4489_s7 + $0xf8] sm:$0xff] }
0x14e6   :  { %v3720_v7 = vpop.eup %3719 }
0x14e7   :  { %v3722_v63 = vpop.eup %3721  ;;  %v2411_v15 = vadd.f32 1.0, %v3720_v7 }
0x14e8   :  { %v2533_v4 = vadd.f32 1.0, %v3722_v63 }
0x14e9   :  { %v3724_v47 = vpop.eup %3723 }
0x14ea   :  { %v2534_v9 = vadd.f32 1.0, %v3724_v47  ;;  %3725 = vrcp.f32 %v2533_v4 }
0x14eb   :  { %3727 = vrcp.f32 %v2411_v15  ;;  %v4335_v15 = vsub.s32 %v462_v52, %v464_v6 }
0x14ec   :  { %3729 = vrcp.f32 %v2534_v9 }
0x14ed   :  { %v797_v47 = vrot.slane %v4027_v11, %v4335_v15  ;;  %v2782_v11 = vld [vmem:[%s4489_s7 + $0x88] sm:$0xff] }
0x14f4   :  { %v3726_v56 = vpop.eup %3725 }
0x14f5   :  { %v3728_v14 = vpop.eup %3727  ;;  %v2539_v19 = vmul.f32 2.0, %v3726_v56  ;;  %v2543_v32 = vmul.f32 %v3726_v56, %v4271_v39 }
0x14f6   :  { %v3730_v20 = vpop.eup %3729  ;;  %v2414_v16 = vmul.f32 2.0, %v3728_v14  ;;  %v2416_v40 = vmul.f32 %v3728_v14, %v4263_v33 }
0x14f7   :  { %v2970_v22 = vadd.f32 -1.0, %v2539_v19  ;;  %v2540_v60 = vmul.f32 2.0, %v3730_v20  ;;  %v2544_v37 = vmul.f32 %v3730_v20, %v4267_v36  ;;  %v1780_v19 = vrot.slane %v4227_v34, %v4335_v15  ;;  %v2766_v34 = vld [vmem:[%s4489_s7 + $0x8] sm:$0xff] }
0x14f8   :  { %v2966_v10 = vadd.f32 -1.0, %v2414_v16  ;;  %v2784_v16 = vld [vmem:[%s4489_s7 + $0x98] sm:$0xff] }
0x14f9   :  { %2547 = vrot.lane.b32.xlu0 %v2970_v22, %s3771_s2  ;;  %v2971_v12 = vadd.f32 -1.0, %v2540_v60 }
0x14fb   :  { %2549 = vrot.lane.b32.xlu1 %v2971_v12, %s3771_s2  ;;  %v2783_v12 = vld [vmem:[%s4489_s7 + $0x90] sm:$0xff] }
0x14ff   :  { %2418 = vrot.lane.b32.xlu1 %v2966_v10, %s3771_s2  ;;  %v2110_v10 = vrot.slane %v4277_v42, %v4335_v15  ;;  %v2786_v42 = vld [vmem:[%s4489_s7 + $0xa8] sm:$0xff] }
0x156b   :  { %v2548_v51 = vpop.permute.xlu0 %2547 }
0x156c   :  { %v2553_v25 = vmul.f32 %v3726_v56, %v2548_v51 }
0x156d   :  { %v2550_v28 = vpop.permute.xlu1 %2549 }
0x156e   :  { %v2554_v29 = vmul.f32 %v3730_v20, %v2550_v28  ;;  %2557 = vrot.lane.b32.xlu1 %v2553_v25, %s3772_s27  ;;  %v3563_v25 = vpack.c.bf16 %v2784_v16, %v2783_v12  ;;  %v2767_v28 = vld [vmem:[%s4489_s7 + $0x10] sm:$0xff] }
0x1570   :  { %2559 = vrot.lane.b32.xlu0 %v2554_v29, %s3772_s27  ;;  %v2768_v29 = vld [vmem:[%s4489_s7 + $0x18] sm:$0xff] }
0x1571   :  { %v2419_v30 = vpop.permute.xlu1 %2418 }
0x1572   :  { %v2421_v31 = vmul.f32 %v3728_v14, %v2419_v30  ;;  %v2785_v30 = vld [vmem:[%s4489_s7 + $0xa0] sm:$0xff] }
0x1574   :  { %2423 = vrot.lane.b32.xlu0 %v2421_v31, %s3772_s27  ;;  %v3565_v31 = vpack.c.bf16 %v2768_v29, %v2767_v28 }
0x15e0   :  { %v2558_v61 = vpop.permute.xlu1 %2557 }
0x15e1   :  { %v2563_v35 = vadd.f32 %v2558_v61, %v2543_v32  ;;  %v3567_v32 = vpack.c.bf16 %v2786_v42, %v2785_v30  ;;  %v2769_v61 = vld [vmem:[%s4489_s7 + $0x20] sm:$0xff] }
0x15e2   :  { %v2560_v38 = vpop.permute.xlu0 %2559 }
0x15e3   :  { %3731 = vtanh.f32 %v2563_v35  ;;  %v2564_v17 = vadd.f32 %v2560_v38, %v2544_v37  ;;  %v2770_v35 = vld [vmem:[%s4489_s7 + $0x28] sm:$0xff]  ;;  %v1128_v37 = vrot.slane %v4076_v3, %v4335_v15  ;;  %v2787_v38 = vld [vmem:[%s4489_s7 + $0xb0] sm:$0xff]  ;;  %v2772_v3 = vld [vmem:[%s4489_s7 + $0x38] sm:$0xff] }
0x15e5   :  { %3733 = vtanh.f32 %v2564_v17  ;;  %v2788_v17 = vld [vmem:[%s4489_s7 + $0xb8] sm:$0xff] }
0x15e6   :  { %v2424_v21 = vpop.permute.xlu0 %2423 }
0x15e7   :  { %v4317_v41 = vadd.f32 %v2424_v21, %v2416_v40  ;;  %v3569_v40 = vpack.c.bf16 %v2770_v35, %v2769_v61  ;;  %v3571_v21 = vpack.c.bf16 %v2788_v17, %v2787_v38 }
0x15e9   :  { %3735 = vtanh.f32 %v4317_v41 }
0x15ed   :  { %v3732_v23 = vpop.eup %3731 }
0x15ee   :  { %2569 = vrot.lane.b32.xlu0 %v3732_v23, %s3771_s2  ;;  %v2771_v23 = vld [vmem:[%s4489_s7 + $0x30] sm:$0xff] }
0x15ef   :  { %v3734_v43 = vpop.eup %3733 }
0x15f0   :  { %2571 = vrot.lane.b32.xlu1 %v3734_v43, %s3771_s2  ;;  %v3573_v43 = vpack.c.bf16 %v2772_v3, %v2771_v23 }
0x15f3   :  { %v3736_v39 = vpop.eup %3735 }
0x15f4   :  { %2429 = vrot.lane.b32.xlu1 %v3736_v39, %s3771_s2 }
0x1660   :  { %v2570_v36 = vpop.permute.xlu0 %2569 }
0x1661   :  { %v2575_v48 = vmul.f32 %v3726_v56, %v2570_v36  ;;  %v2789_v36 = vld [vmem:[%s4489_s7 + $0xc0] sm:$0xff] }
0x1662   :  { %v2572_v45 = vpop.permute.xlu1 %2571 }
0x1663   :  { %v2576_v46 = vmul.f32 %v3730_v20, %v2572_v45  ;;  %v2765_v20 = vld [vmem:[%s4489_s7] sm:$0xff]  ;;  %v2790_v45 = vld [vmem:[%s4489_s7 + $0xc8] sm:$0xff] }
0x1664   :  { %v3561_v51 = vpack.c.bf16 %v2766_v34, %v2765_v20 }
0x1665   :  { %v2661_v49 = vrot.slane %v2576_v46, 7 }
0x1666   :  { %v2430_v33 = vpop.permute.xlu1 %2429 }
0x1667   :  { %v4323_v50 = vmul.f32 %v3728_v14, %v2430_v33  ;;  %v2662_v54 = vsel %vm357_vm3, %v2661_v49, %v2575_v48  ;;  %v3575_v48 = vpack.c.bf16 %v2790_v45, %v2789_v36  ;;  %v2773_v49 = vld [vmem:[%s4489_s7 + $0x40] sm:$0xff]  ;;  %v2774_v33 = vld [vmem:[%s4489_s7 + $0x48] sm:$0xff] }
0x1668   :  { %2663 = vrot.lane.b32.xlu1 %v2662_v54, %s3772_s27 }
0x1669   :  { %2585 = vrot.lane.b32.xlu0 %v4323_v50, %s3772_s27 }
0x16da   :  { %v2664_v13 = vpop.permute.xlu1 %2663 }
0x16db   :  { %v2586_v27 = vpop.permute.xlu0 %2585  ;;  %3409 = vmatmul.mubr.msk.f32.vlgmr.msra.gmra.mrb[28].mxu0 %vm146_vm4, %v2664_v13  ;;  %v2791_v13 = vld [vmem:[%s4489_s7 + $0xd0] sm:$0xff] }
0x16dc   :  { %3398 = vmatmul.mubr.msk.f32.vlgmr.msra.gmra.mrb[18].mxu1 %vm146_vm4, %v2586_v27  ;;  %v2792_v27 = vld [vmem:[%s4489_s7 + $0xd8] sm:$0xff] }
0x17ae   :  { %v2733_v24 = vpop.f32.mrb[28].mxu0 }
0x17af   :  { %v2655_v55 = vpop.f32.mrb[18].mxu1  ;;  %v3410_v58 = vpop.f32.mrb[29].mxu0 }
0x17b0   :  { %v2734_v26 = vadd.f32 %v2733_v24, %v2655_v55  ;;  %v3399_v62 = vpop.f32.mrb[19].mxu1  ;;  %v3579_v55 = vpack.c.bf16 %v2792_v27, %v2791_v13  ;;  %v2775_v58 = vld [vmem:[%s4489_s7 + $0x50] sm:$0xff] }
0x17b2   :  { %v2737_v8 = vadd.f32 %v4305_v59, %v2734_v26  ;;  %v466_v59 = vrot.slane %v3978_v1, %v4335_v15  ;;  %v2781_v1 = vld [vmem:[%s4489_s7 + $0x80] sm:$0xff]  ;;  %v2776_v26 = vld [vmem:[%s4489_s7 + $0x58] sm:$0xff] }
0x17b3   :  { %v3559_v60 = vpack.c.bf16 %v2782_v11, %v2781_v1  ;;  %v3581_v62 = vpack.c.bf16 %v2776_v26, %v2775_v58 }
0x17b4   :  { %v2974_v0 = vmul.f32 -1.442695, %v2737_v8  ;;  %v2793_v8 = vld [vmem:[%s4489_s7 + $0xe0] sm:$0xff] }
0x17b5   :  { %3560 = vmatprep.subr.bf16.mxu1 %v3559_v60  ;;  %v2976_v60 = vld [vmem:[%s4490_s8] ss:$0 sm:$0xff] }
0x17b6   :  { %3737 = vpow2.f32 %v2974_v0  ;;  %3562 = vmatpush3.bf16.msra.mxu1 %v3561_v51  ;;  %v2794_v0 = vld [vmem:[%s4489_s7 + $0xe8] sm:$0xff] }
0x17b7   :  { %3564 = vmatprep.subr.bf16.mxu1 %v3563_v25 }
0x17ba   :  { %3566 = vmatpush3.bf16.msra.mxu1 %v3565_v31 }
0x17bb   :  { %3568 = vmatprep.subr.bf16.mxu1 %v3567_v32 }
0x17be   :  { %3570 = vmatpush3.bf16.msra.mxu1 %v3569_v40 }
0x17bf   :  { %3572 = vmatprep.subr.bf16.mxu1 %v3571_v21 }
0x17c0   :  { %v3738_v5 = vpop.eup %3737 }
0x17c1   :  { %v2741_v44 = vadd.f32 1.0, %v3738_v5  ;;  %v2777_v5 = vld [vmem:[%s4489_s7 + $0x60] sm:$0xff] }
0x17c2   :  { %3574 = vmatpush3.bf16.msra.mxu1 %v3573_v43  ;;  %v3585_v6 = vpack.c.bf16 %v2778_v57, %v2777_v5 }
0x17c3   :  { %3739 = vrcp.f32 %v2741_v44  ;;  %3576 = vmatprep.subr.bf16.mxu1 %v3575_v48  ;;  %v3583_v44 = vpack.c.bf16 %v2794_v0, %v2793_v8 }
0x17cd   :  { %v4332_v7 = vpop.eup %3739 }
0x17ce   :  { %v2744_v63 = vmul.f32 2.0, %v4332_v7  ;;  %v2746_v39 = vmul.f32 %v4332_v7, %v4317_v41  ;;  %v3577_v41 = vpack.c.bf16 %v2774_v33, %v2773_v49 }
0x17d0   :  { %v2975_v4 = vadd.f32 -1.0, %v2744_v63  ;;  %3578 = vmatpush3.bf16.msra.mxu1 %v3577_v41  ;;  %v3587_v63 = vpack.c.bf16 %v2796_v53, %v2795_v2 }
0x17d1   :  { %3580 = vmatprep.subr.bf16.mxu1 %v3579_v55 }
0x17d2   :  { %2748 = vrot.lane.b32.xlu0 %v2975_v4, %s3771_s2  ;;  %v2779_v4 = vld [vmem:[%s4489_s7 + $0x70] sm:$0xff] }
0x17d4   :  { %3582 = vmatpush3.bf16.msra.mxu1 %v3581_v62 }
0x17d5   :  { %3584 = vmatprep.subr.bf16.mxu1 %v3583_v44 }
0x17d6   :  { %467 = vrot.lane.b32.xlu0 %v466_v59, %s3772_s27  ;;  %v2780_v59 = vld [vmem:[%s4489_s7 + $0x78] sm:$0xff] }
0x17d8   :  { %3586 = vmatpush3.bf16.msra.mxu1 %v3585_v6 }
0x17d9   :  { %3588 = vmatprep.subr.bf16.mxu1 %v3587_v63 }
0x17da   :  { %798 = vrot.lane.b32.xlu0 %v797_v47, %s3771_s2  ;;  %v3589_v47 = vpack.c.bf16 %v2780_v59, %v2779_v4 }
0x17dc   :  { %3590 = vmatpush3.bf16.msra.mxu1 %v3589_v47 }
0x1844   :  { %v2749_v9 = vpop.permute.xlu0 %2748 }
0x1845   :  { %v2751_v56 = vmul.f32 %v4332_v7, %v2749_v9 }
0x1847   :  { %2753 = vrot.lane.b32.xlu1 %v2751_v56, %s3772_s27 }
0x1848   :  { %v468_v14 = vpop.permute.xlu0 %467 }
0x1849   :  { %471 = vst.msk [vmem:[#allocation3] sm:$0x3] %vm470_vm5, %v468_v14  ;;  %v2440_v14 = vrot.slane %v4323_v50, %v4335_v15 }
0x184b   :  { %1781 = vrot.lane.b32.xlu1 %v1780_v19, %s3772_s27 }
0x184c   :  { %v799_v22 = vpop.permute.xlu0 %798 }
0x184d   :  { %802 = vst.msk [vmem:[#allocation3] sm:$0x3] %vm801_vm6, %v799_v22 }
0x184f   :  { %2111 = vrot.lane.b32.xlu1 %v2110_v10, %s3771_s2 }
0x1853   :  { %1129 = vrot.lane.b32.xlu1 %v1128_v37, %s3774_s25 }
0x18b9   :  { %v2754_v46 = vpop.permute.xlu1 %2753 }
0x18ba   :  { %v2756_v54 = vadd.f32 %v2754_v46, %v2746_v39 }
0x18bc   :  { %3741 = vtanh.f32 %v2756_v54 }
0x18bd   :  { %v1782_v24 = vpop.permute.xlu1 %1781 }
0x18be   :  { %1784 = vst.msk [vmem:[#allocation3 + $0x2] sm:$0x3] %vm470_vm5, %v1782_v24 }
0x18c1   :  { %v2112_v52 = vpop.permute.xlu1 %2111 }
0x18c2   :  { %2114 = vst.msk [vmem:[#allocation3 + $0x2] sm:$0x3] %vm801_vm6, %v2112_v52 }
0x18c5   :  { %v1130_v9 = vpop.permute.xlu1 %1129 }
0x18c6   :  { %v3742_v56 = vpop.eup %3741  ;;  %1133 = vst.msk [vmem:[#allocation3] sm:$0x3] %vm1132_vm7, %v1130_v9 }
0x18c7   :  { %1453 = vst.msk [vmem:[#allocation3] sm:$0x3] %vm1452_vm8, %v4125_v18  ;;  %2759 = vrot.lane.b32.xlu0 %v3742_v56, %s3771_s2 }
0x18cb   :  { %2441 = vrot.lane.b32.xlu0 %v2440_v14, %s3774_s25  ;;  %s2893_s25 = sshll.u32 %s3775_s13, 4  ;;  %s2894_s25 = int_to_ptr.vmem [resolvable:$true] %s2893_s25 }
0x18cc   :  { %s3744_s14 = scalar_lea.vmem %s2894_s25, 32  ;;  %p3749_p1 = scmp.lt.s32.totalorder %s2894_s25, %s2894_s25 }
0x18cd   :  { %p3745_p0 = scmp.ne.s32.totalorder %s2894_s25, %s3744_s14  ;;  %p3750_p2 = scmp.lt.s32.totalorder %s3744_s14, %s3744_s14 }
0x18cf   :  { %p3751_p3 = por %p3750_p2, %p3749_p1 }
0x18d1   :  { %p3752_p4 = pnand %p3751_p3, %p3745_p0 }
0x1939   :  { %v2760_v19 = vpop.permute.xlu0 %2759 }
0x193a   :  { %v2762_v1 = vmul.f32 %v4332_v7, %v2760_v19 }
0x193d   :  { %v2442_v11 = vpop.permute.xlu0 %2441 }
0x193e   :  { %2444 = vst.msk [vmem:[#allocation3 + $0x2] sm:$0x3] %vm1132_vm7, %v2442_v11 }
0x193f   :  { %2763 = vst.msk [vmem:[#allocation3 + $0x2] sm:$0x3] %vm1452_vm8, %v2762_v1 }
0x1946   :  { %v2977_v20 = vld.sshfl [vmem:[#allocation3] sm:$0x33 pattern:$0x76325410] }
0x1947   :  { %v2812_v22 = vcombine.high %v2977_v20, %v2977_v20 }
0x1949   :  { %2879 = vmatprep.mubr.f32.mxu1 %v2812_v22 }
0x194a   :  { %2880 = vmatmul.mubr.f32.vlgmr.msra.gmra.mrb[20].mxu1 %v2977_v20 }
0x1a1d   :  { %v3135_v18 = vpop.f32.mrb[20].mxu1 }
0x1a1e   :  { %v3136_v50 = vpop.f32.mrb[21].mxu1 }
0x1a1f   :  { %v3137_v15 = vadd.f32 %v3136_v50, %v3135_v18 }
0x1a21   :  { %v2882_v7 = vadd.f32 %v3137_v15, %v2976_v60 }
0x1a23   :  { %2886 = vst.msk [vmem:[#allocation4] sm:$0x3] %vm2885_vm9, %v2882_v7 }
0x1a24   :  { %3755 = shalt.err (!%p3752_p4)
}
0x1a25   :  { %s3756_s17 = scalar_lea.hbm %s4491_s9, 32 }
0x1a26   :  { %p3757_p5 = scmp.ne.s32.totalorder %s4491_s9, %s3756_s17  ;;  %p3760_p6 = scmp.lt.u32.totalorder %s3756_s17, %s4491_s9 }
0x1a28   :  { %p3762_p7 = pnand %p3760_p6, %p3757_p5 }
0x1a2a   :  { %3765 = shalt.err (!%p3762_p7)
}
0x1a2b   :  { %2896 = dma.vmem_to_hbm [thread:$0]  %s2894_s25, 32, %s4491_s9, [#allocation5]  }
0x1a2c   :  { %3766 = dma.done.wait [#allocation5], 32  }
0x1a2d   :  { %3767 = vsyncadd [#allocation5], 4294967264 }
0x1a2e   :  { %2900 = vsyncpa [#allocation5], 1 }

</bundles_post_ra>
